<compile_context>
chip_gen: v7x
topology: tpu7x:2x2x1
jax: 0.10.0
libtpu: 0.0.40
codegen_flags: <defaults>
</compile_context>

<pallas_src>
import functools

import jax
import jax.numpy as jnp
from jax.experimental import pallas as pl
from jax.experimental.pallas import tpu as pltpu

_ALIGN = 8  # sublane-aligned column offset of the interior inside padded VMEM buffers


def _pick_bblk(batch, cap=8):
    """Largest divisor of `batch` (<= cap) that still leaves >= 2 grid steps
    (so both v7x TensorCores get work under "parallel" semantics)."""
    best = 1
    for d in range(1, min(batch, cap) + 1):
        if batch % d == 0 and (batch // d >= 2 or batch == 1):
            best = d
    return best


def _zero_halo(buf_ref, *, bb, h0, hh, hp, left, a, ww, wp, cc):
    """Zero only the halo strips the depthwise taps actually read.

    Executed every grid step (it is tiny) rather than once under
    pl.when(program_id==0): scratch is per-TensorCore, so a pid==0-gated init
    would be skipped on the second core when the grid is sharded (v7x).
    The interior [h0:h0+hh, a:a+ww] is fully overwritten every step.
    """
    if h0 > 0:                                    # top halo rows, full width
        buf_ref[:, 0:h0, :, :] = jnp.zeros((bb, h0, wp, cc), jnp.float32)
    if hp - (h0 + hh) > 0:                        # bottom halo rows, full width
        buf_ref[:, h0 + hh:hp, :, :] = jnp.zeros((bb, hp - h0 - hh, wp, cc), jnp.float32)
    if left > 0:                                  # left halo cols (interior rows)
        buf_ref[:, h0:h0 + hh, a - left:a, :] = jnp.zeros((bb, hh, left, cc), jnp.float32)
    if wp - (a + ww) > 0:                         # right halo cols (interior rows)
        buf_ref[:, h0:h0 + hh, a + ww:wp, :] = jnp.zeros((bb, hh, wp - a - ww, cc), jnp.float32)


# ---------------------------------------------------------------------------
# Fused kernel: stride == 1
#   input lanes = [x_proj (even ch) | x_main (odd ch)]
#   out   lanes = [x_proj | pw1+BN+ReLU -> dwKxK+BN -> pw2+BN+ReLU (x_main)]
# ---------------------------------------------------------------------------
def _block_s1_kernel(x_ref, w1_ref, b1_ref, wdw_ref, b2_ref, w2_ref, b3_ref,
                     o_ref, mbuf_ref,
                     *, H, W, K, pad, inp, mid, outs, Bblk):
    A = _ALIGN
    Hp = H + 2 * pad
    Wp = W + A + pad

    _zero_halo(mbuf_ref, bb=Bblk, h0=pad, hh=H, hp=Hp, left=pad, a=A, ww=W, wp=Wp, cc=mid)

    x = x_ref[...].astype(jnp.float32)                 # (Bblk, H, W, 2*inp)
    x_proj = x[..., :inp]                              # pass-through half

    # pw1 (1x1 + BN + ReLU).  w1 is the (2*inp, mid) zero-extended folded
    # weight, so the odd-channel selection happens inside the matmul
    # (no lane slicing of the activation).
    h1 = jnp.dot(x.reshape(Bblk * H * W, 2 * inp), w1_ref[...],
                 preferred_element_type=jnp.float32) + b1_ref[...]
    h1 = jnp.maximum(h1, 0.0)
    mbuf_ref[:, pad:pad + H, A:A + W, :] = h1.reshape(Bblk, H, W, mid)

    # depthwise KxK + BN: unit-stride shifted windows read per tap from the Ref
    acc = jnp.zeros((Bblk, H, W, mid), jnp.float32)
    for kh in range(K):
        for kw in range(K):
            c0 = A - pad + kw
            win = mbuf_ref[:, kh:kh + H, c0:c0 + W, :]
            acc = acc + win * wdw_ref[kh * K + kw, :]
    h2 = acc + b2_ref[...]

    # pw2 (1x1 + BN + ReLU)
    h3 = jnp.dot(h2.reshape(Bblk * H * W, mid), w2_ref[...],
                 preferred_element_type=jnp.float32) + b3_ref[...]
    h3 = jnp.maximum(h3, 0.0)

    # fused channel concat [x_proj | branch_main] -> single lane-dense store
    o_ref[...] = jnp.concatenate(
        [x_proj, h3.reshape(Bblk, H, W, outs)], axis=-1).astype(o_ref.dtype)


def _shuffle_block_s1(x_packed, w1e, b1, wdw, b2, w2, b3, *, ksize, inp):
    B, H, W, c2 = x_packed.shape
    assert c2 == 2 * inp
    mid = wdw.shape[1]
    outs = w2.shape[1]
    pad = ksize // 2
    assert pad <= _ALIGN
    bblk = _pick_bblk(B)

    kern = functools.partial(_block_s1_kernel, H=H, W=W, K=ksize, pad=pad,
                             inp=inp, mid=mid, outs=outs, Bblk=bblk)
    x_map = lambda b: (b, 0, 0, 0)
    w_map = lambda b: (0, 0)

    return pl.pallas_call(
        kern,
        out_shape=jax.ShapeDtypeStruct((B, H, W, inp + outs), x_packed.dtype),
        grid_spec=pltpu.PrefetchScalarGridSpec(
            num_scalar_prefetch=0,
            grid=(B // bblk,),
            in_specs=[
                pl.BlockSpec((bblk, H, W, 2 * inp), x_map),
                pl.BlockSpec((2 * inp, mid), w_map),
                pl.BlockSpec((1, mid), w_map),
                pl.BlockSpec((ksize * ksize, mid), w_map),
                pl.BlockSpec((1, mid), w_map),
                pl.BlockSpec((mid, outs), w_map),
                pl.BlockSpec((1, outs), w_map),
            ],
            out_specs=pl.BlockSpec((bblk, H, W, inp + outs), x_map),
            scratch_shapes=[
                pltpu.VMEM((bblk, H + 2 * pad, W + _ALIGN + pad, mid), jnp.float32),
            ],
        ),
        compiler_params=pltpu.CompilerParams(
            dimension_semantics=("parallel",),
            vmem_limit_bytes=32 * 1024 * 1024,
        ),
    )(x_packed, w1e, b1, wdw, b2, w2, b3)


# ---------------------------------------------------------------------------
# Fused kernel: stride == 2 (branch_proj + branch_main, one combined output)
#   input lanes = 4 spatial phases (space-to-depth) x inp channels
# ---------------------------------------------------------------------------
def _block_s2_kernel(x_ref, wpdw_ref, bp1_ref, wppw_ref, bp2_ref,
                     w1_ref, b1_ref, wdw_ref, b2_ref, w2_ref, b3_ref,
                     o_ref, xbuf_ref, mbuf_ref,
                     *, Ho, Wo, K, pad, inp, mid, outs, Bblk):
    A = _ALIGN
    hb = (pad + 1) // 2          # leading halo the stride-2 taps actually read
    ha = pad // 2                # trailing halo
    Hp = Ho + hb + ha
    Wp = Wo + A + ha

    _zero_halo(xbuf_ref, bb=Bblk, h0=hb, hh=Ho, hp=Hp, left=hb, a=A, ww=Wo, wp=Wp, cc=4 * inp)
    _zero_halo(mbuf_ref, bb=Bblk, h0=hb, hh=Ho, hp=Hp, left=hb, a=A, ww=Wo, wp=Wp, cc=4 * mid)

    # x is phase-packed NHWC: lanes [p*inp:(p+1)*inp] hold spatial phase
    # p = 2*row_parity + col_parity (space-to-depth folded into the wrapper's
    # single NCHW->NHWC transpose -> no strided reads needed in-kernel).
    x = x_ref[...].astype(jnp.float32)                      # (Bblk, Ho, Wo, 4*inp)
    xbuf_ref[:, hb:hb + Ho, A:A + Wo, :] = x                # interior fully overwritten

    # branch_main pw1 (1x1 + BN + ReLU) for all four phases in ONE MXU matmul:
    # w1_ref is the block-diagonal kron(I4, W1) folded weight.
    h1 = jnp.dot(x.reshape(Bblk * Ho * Wo, 4 * inp), w1_ref[...],
                 preferred_element_type=jnp.float32) + b1_ref[...]
    h1 = jnp.maximum(h1, 0.0)
    mbuf_ref[:, hb:hb + Ho, A:A + Wo, :] = h1.reshape(Bblk, Ho, Wo, 4 * mid)

    def dw_s2(buf_ref, w_ref, b_ref, C):
        """Stride-2 depthwise KxK + BN via unit-stride windows on phase buffers."""
        acc = jnp.zeros((Bblk, Ho, Wo, C), jnp.float32)
        for kh in range(K):
            for kw in range(K):
                rh = (kh + pad) % 2
                rw = (kw + pad) % 2
                p = 2 * rh + rw
                r0 = hb + (kh - pad - rh) // 2
                c0 = A + (kw - pad - rw) // 2
                # Window read straight from the Ref (keeps live ranges small).
                # TODO(synk): once 4*C > 128 lanes, slice the lane range on the
                # Ref instead of loading all four phases per tap.
                win = buf_ref[:, r0:r0 + Ho, c0:c0 + Wo, :]
                win = win[..., p * C:(p + 1) * C]
                acc = acc + win * w_ref[kh * K + kw, :]
        return acc + b_ref[...]

    # branch_proj: dw(stride 2) + BN -> 1x1 + BN + ReLU
    yp = dw_s2(xbuf_ref, wpdw_ref, bp1_ref, inp)
    yp = jnp.dot(yp.reshape(Bblk * Ho * Wo, inp), wppw_ref[...],
                 preferred_element_type=jnp.float32) + bp2_ref[...]
    yp = jnp.maximum(yp, 0.0)

    # branch_main: dw(stride 2) + BN -> 1x1 + BN + ReLU
    ym = dw_s2(mbuf_ref, wdw_ref, b2_ref, mid)
    ym = jnp.dot(ym.reshape(Bblk * Ho * Wo, mid), w2_ref[...],
                 preferred_element_type=jnp.float32) + b3_ref[...]
    ym = jnp.maximum(ym, 0.0)

    # fused channel concat [branch_proj | branch_main] -> single lane-dense store
    o_ref[...] = jnp.concatenate(
        [yp.reshape(Bblk, Ho, Wo, inp), ym.reshape(Bblk, Ho, Wo, outs)],
        axis=-1).astype(o_ref.dtype)


def _shuffle_block_s2(x_packed, wpdw, bp1, wppw, bp2, w1bd, b1bd, wdw, b2, w2, b3,
                      *, ksize, inp):
    B, Ho, Wo, c4 = x_packed.shape
    assert c4 == 4 * inp
    mid = wdw.shape[1]
    outs = w2.shape[1]
    pad = ksize // 2
    assert pad <= _ALIGN
    bblk = _pick_bblk(B)
    hb, ha = (pad + 1) // 2, pad // 2
    Hp, Wp = Ho + hb + ha, Wo + _ALIGN + ha

    kern = functools.partial(_block_s2_kernel, Ho=Ho, Wo=Wo, K=ksize, pad=pad,
                             inp=inp, mid=mid, outs=outs, Bblk=bblk)
    x_map = lambda b: (b, 0, 0, 0)
    w_map = lambda b: (0, 0)

    return pl.pallas_call(
        kern,
        out_shape=jax.ShapeDtypeStruct((B, Ho, Wo, inp + outs), x_packed.dtype),
        grid_spec=pltpu.PrefetchScalarGridSpec(
            num_scalar_prefetch=0,
            grid=(B // bblk,),
            in_specs=[
                pl.BlockSpec((bblk, Ho, Wo, 4 * inp), x_map),
                pl.BlockSpec((ksize * ksize, inp), w_map),
                pl.BlockSpec((1, inp), w_map),
                pl.BlockSpec((inp, inp), w_map),
                pl.BlockSpec((1, inp), w_map),
                pl.BlockSpec((4 * inp, 4 * mid), w_map),
                pl.BlockSpec((1, 4 * mid), w_map),
                pl.BlockSpec((ksize * ksize, mid), w_map),
                pl.BlockSpec((1, mid), w_map),
                pl.BlockSpec((mid, outs), w_map),
                pl.BlockSpec((1, outs), w_map),
            ],
            out_specs=pl.BlockSpec((bblk, Ho, Wo, inp + outs), x_map),
            scratch_shapes=[
                pltpu.VMEM((bblk, Hp, Wp, 4 * inp), jnp.float32),
                pltpu.VMEM((bblk, Hp, Wp, 4 * mid), jnp.float32),
            ],
        ),
        compiler_params=pltpu.CompilerParams(
            dimension_semantics=("parallel",),
            vmem_limit_bytes=32 * 1024 * 1024,
        ),
    )(x_packed, wpdw, bp1, wppw, bp2, w1bd, b1bd, wdw, b2, w2, b3)


# ---------------------------------------------------------------------------
# Parameter helpers (inference-mode BN folded into conv weights)
# ---------------------------------------------------------------------------
def _fold_bn(gamma, beta, mean, var, eps=1e-5):
    scale = gamma / jnp.sqrt(var + eps)
    bias = beta - mean * scale
    return scale, bias


def _init_bn(key, c):
    k1, k2, k3, k4 = jax.random.split(key, 4)
    gamma = 1.0 + 0.1 * jax.random.normal(k1, (c,), jnp.float32)
    beta = 0.05 * jax.random.normal(k2, (c,), jnp.float32)
    mean = 0.02 * jax.random.normal(k3, (c,), jnp.float32)
    var = 0.5 + 0.1 * jnp.abs(jax.random.normal(k4, (c,), jnp.float32))
    return _fold_bn(gamma, beta, mean, var)


# ---------------------------------------------------------------------------
# ShuffleV2Block (NCHW module boundary, matching the PyTorch reference)
# ---------------------------------------------------------------------------
class ShuffleV2Block:
    def __init__(self, inp, oup, mid_channels, *, ksize, stride, key):
        assert stride in (1, 2)
        self.inp = inp
        self.oup = oup
        self.mid = mid_channels
        self.ksize = ksize
        self.stride = stride
        self.pad = ksize // 2
        self.outputs = oup - inp

        keys = jax.random.split(key, 10)

        # branch_main: 1x1 -> BN -> ReLU -> dw KxK -> BN -> 1x1 -> BN -> ReLU
        w1 = 0.1 * jax.random.normal(keys[0], (inp, mid_channels), jnp.float32)
        s1, b1 = _init_bn(keys[1], mid_channels)
        self.w_pw1 = w1 * s1[None, :]                 # BN scale folded into weight
        self.b1 = b1.reshape(1, mid_channels)

        wdw = 0.1 * jax.random.normal(keys[2], (ksize * ksize, mid_channels), jnp.float32)
        s2, b2 = _init_bn(keys[3], mid_channels)
        self.w_dw = wdw * s2[None, :]
        self.b2 = b2.reshape(1, mid_channels)

        w2 = 0.1 * jax.random.normal(keys[4], (mid_channels, self.outputs), jnp.float32)
        s3, b3 = _init_bn(keys[5], self.outputs)
        self.w_pw2 = w2 * s3[None, :]
        self.b3 = b3.reshape(1, self.outputs)

        if stride == 1:
            # pw1 weight zero-extended to (2*inp, mid): top half (even / proj
            # channels) is zero so the odd-channel selection happens in the matmul.
            self.w_pw1_ext = jnp.concatenate(
                [jnp.zeros((inp, mid_channels), jnp.float32), self.w_pw1], axis=0)
        else:
            # branch_proj: dw KxK -> BN -> 1x1 -> BN -> ReLU
            wpdw = 0.1 * jax.random.normal(keys[6], (ksize * ksize, inp), jnp.float32)
            sp1, bp1 = _init_bn(keys[7], inp)
            self.w_pdw = wpdw * sp1[None, :]
            self.bp1 = bp1.reshape(1, inp)
            wppw = 0.1 * jax.random.normal(keys[8], (inp, inp), jnp.float32)
            sp2, bp2 = _init_bn(keys[9], inp)
            self.w_ppw = wppw * sp2[None, :]
            self.bp2 = bp2.reshape(1, inp)
            # pw1 applied to all four spatial phases in one matmul: block-diag weight.
            self.w_pw1_bd = jnp.kron(jnp.eye(4, dtype=jnp.float32), self.w_pw1)
            self.b1_bd = jnp.tile(self.b1, (1, 4))

    def __call__(self, old_x):  # NCHW in, NCHW out (PyTorch module boundary)
        if self.stride == 1:
            B, C, H, W = old_x.shape
            assert C % 4 == 0 and C == 2 * self.inp
            # channel_shuffle folded into the single NCHW->NHWC transpose:
            # lanes [0:inp] = even channels (x_proj), [inp:2*inp] = odd (x_main).
            xp = old_x.reshape(B, self.inp, 2, H, W)
            xp = jnp.transpose(xp, (0, 3, 4, 2, 1)).reshape(B, H, W, 2 * self.inp)
            y = _shuffle_block_s1(xp, self.w_pw1_ext, self.b1, self.w_dw, self.b2,
                                  self.w_pw2, self.b3, ksize=self.ksize, inp=self.inp)
            return jnp.transpose(y, (0, 3, 1, 2))
        else:  # stride == 2
            B, C, H, W = old_x.shape
            # TODO(synk): stride-2 path requires even spatial dims (phase split).
            assert C == self.inp and H % 2 == 0 and W % 2 == 0
            Ho, Wo = H // 2, W // 2
            # space-to-depth folded into the single NCHW->NHWC transpose:
            # lane = (2*row_parity + col_parity)*inp + channel
            xp = old_x.reshape(B, C, Ho, 2, Wo, 2)
            xp = jnp.transpose(xp, (0, 2, 4, 3, 5, 1)).reshape(B, Ho, Wo, 4 * C)
            y = _shuffle_block_s2(xp, self.w_pdw, self.bp1, self.w_ppw, self.bp2,
                                  self.w_pw1_bd, self.b1_bd, self.w_dw, self.b2,
                                  self.w_pw2, self.b3, ksize=self.ksize, inp=self.inp)
            return jnp.transpose(y, (0, 3, 1, 2))


# ---------------------------------------------------------------------------
# Pure-JAX (XLA) reference with identical math, for a numeric sanity check
# ---------------------------------------------------------------------------
def _reference_forward(block, old_x):
    def pw(x, w, b, relu):
        y = jnp.einsum('bhwc,cd->bhwd', x, w,
                       precision=jax.lax.Precision.HIGHEST) + b.reshape(1, 1, 1, -1)
        return jnp.maximum(y, 0.0) if relu else y

    def dw(x, wkk, b, K, stride, pad):
        xp = jnp.pad(x, ((0, 0), (pad, pad), (pad, pad), (0, 0)))
        Bn, Hp, Wp, C = xp.shape
        Ho = (Hp - K) // stride + 1
        Wo = (Wp - K) // stride + 1
        acc = jnp.zeros((Bn, Ho, Wo, C), jnp.float32)
        for kh in range(K):
            for kw in range(K):
                win = jax.lax.slice(
                    xp, (0, kh, kw, 0),
                    (Bn, kh + stride * (Ho - 1) + 1, kw + stride * (Wo - 1) + 1, C),
                    (1, stride, stride, 1))
                acc = acc + win * wkk[kh * K + kw]
        return acc + b.reshape(1, 1, 1, -1)

    def main(x):
        y = pw(x, block.w_pw1, block.b1, True)
        y = dw(y, block.w_dw, block.b2, block.ksize, block.stride, block.pad)
        return pw(y, block.w_pw2, block.b3, True)

    if block.stride == 1:
        x_proj = old_x[:, 0::2, :, :]
        x = jnp.transpose(old_x[:, 1::2, :, :], (0, 2, 3, 1))
        return jnp.concatenate([x_proj, jnp.transpose(main(x), (0, 3, 1, 2))], axis=1)
    else:
        x = jnp.transpose(old_x, (0, 2, 3, 1))
        p = dw(x, block.w_pdw, block.bp1, block.ksize, block.stride, block.pad)
        p = pw(p, block.w_ppw, block.bp2, True)
        return jnp.concatenate([jnp.transpose(p, (0, 3, 1, 2)),
                                jnp.transpose(main(x), (0, 3, 1, 2))], axis=1)


# ---------------------------------------------------------------------------
if __name__ == "__main__":
    key = jax.random.PRNGKey(0)
    k1, k2, k3, k4 = jax.random.split(key, 4)

    inp, oup, mid, ksize = 4, 8, 4, 3

    # --- stride=1 block (channel-shuffle path); input channels = 2*inp ---
    blk1 = ShuffleV2Block(inp, oup, mid, ksize=ksize, stride=1, key=k1)
    x1 = jax.random.normal(k2, (2, 2 * inp, 16, 16), jnp.float32)   # NCHW
    out1 = jax.block_until_ready(jax.jit(blk1.__call__)(x1))
    assert out1.shape == (2, oup, 16, 16), out1.shape
    ref1 = _reference_forward(blk1, x1)
    assert float(jnp.max(jnp.abs(out1 - ref1))) < 5e-2

    # --- stride=2 block (downsampling path) ---
    blk2 = ShuffleV2Block(inp, oup, mid, ksize=ksize, stride=2, key=k3)
    x2 = jax.random.normal(k4, (2, inp, 16, 16), jnp.float32)       # NCHW
    out2 = jax.block_until_ready(jax.jit(blk2.__call__)(x2))
    assert out2.shape == (2, oup, 8, 8), out2.shape
    ref2 = _reference_forward(blk2, x2)
    assert float(jnp.max(jnp.abs(out2 - ref2))) < 5e-2

    print("KERNEL_OK")
</pallas_src>

<mosaic_0001>
module attributes {stable_mosaic.version = 11 : i64} {
  func.func @_block_s1_kernel(%arg0: i32, %arg1: memref<1x16x16x8xf32, #tpu.memory_space<vmem>>, %arg2: memref<8x4xf32, #tpu.memory_space<vmem>>, %arg3: memref<1x4xf32, #tpu.memory_space<vmem>>, %arg4: memref<9x4xf32, #tpu.memory_space<vmem>>, %arg5: memref<1x4xf32, #tpu.memory_space<vmem>>, %arg6: memref<4x4xf32, #tpu.memory_space<vmem>>, %arg7: memref<1x4xf32, #tpu.memory_space<vmem>>, %arg8: memref<1x16x16x8xf32, #tpu.memory_space<vmem>>, %arg9: memref<1x18x25x4xf32, #tpu.memory_space<vmem>>) attributes {dimension_semantics = [#tpu.dimension_semantics<parallel>], iteration_bounds = array<i64: 2>, scalar_prefetch = 0 : i64, scratch_operands = 1 : i64, tpu.core_type = #tpu.core_type<tc>, window_params = [{transform_indices = @transform_0, window_bounds = array<i64: 1, 16, 16, 8>}, {pipeline_mode = #tpu.pipeline_mode<synchronous>, transform_indices = @transform_1, window_bounds = array<i64: 8, 4>}, {pipeline_mode = #tpu.pipeline_mode<synchronous>, transform_indices = @transform_2, window_bounds = array<i64: 1, 4>}, {pipeline_mode = #tpu.pipeline_mode<synchronous>, transform_indices = @transform_3, window_bounds = array<i64: 9, 4>}, {pipeline_mode = #tpu.pipeline_mode<synchronous>, transform_indices = @transform_4, window_bounds = array<i64: 1, 4>}, {pipeline_mode = #tpu.pipeline_mode<synchronous>, transform_indices = @transform_5, window_bounds = array<i64: 4, 4>}, {pipeline_mode = #tpu.pipeline_mode<synchronous>, transform_indices = @transform_6, window_bounds = array<i64: 1, 4>}, {transform_indices = @transform_7, window_bounds = array<i64: 1, 16, 16, 8>}]} {
    %cst = arith.constant 0.000000e+00 : f32
    %0 = vector.broadcast %cst : f32 to vector<1x1x25x4xf32>
    %c0 = arith.constant 0 : index
    %c0_0 = arith.constant 0 : index
    %c0_1 = arith.constant 0 : index
    %c0_2 = arith.constant 0 : index
    %1 = vector.load %arg9[%c0, %c0_0, %c0_1, %c0_2] : memref<1x18x25x4xf32, #tpu.memory_space<vmem>>, vector<1x1x25x4xf32>
    tpu.vector_store %arg9[%c0, %c0_0, %c0_1, %c0_2], %0 {strides = array<i32>} : memref<1x18x25x4xf32, #tpu.memory_space<vmem>>, vector<1x1x25x4xf32>,
    %cst_3 = arith.constant 0.000000e+00 : f32
    %2 = vector.broadcast %cst_3 : f32 to vector<1x1x25x4xf32>
    %c0_4 = arith.constant 0 : index
    %c17 = arith.constant 17 : index
    %c0_5 = arith.constant 0 : index
    %c0_6 = arith.constant 0 : index
    %3 = vector.load %arg9[%c0_4, %c17, %c0_5, %c0_6] : memref<1x18x25x4xf32, #tpu.memory_space<vmem>>, vector<1x1x25x4xf32>
    tpu.vector_store %arg9[%c0_4, %c17, %c0_5, %c0_6], %2 {strides = array<i32>} : memref<1x18x25x4xf32, #tpu.memory_space<vmem>>, vector<1x1x25x4xf32>,
    %cst_7 = arith.constant 0.000000e+00 : f32
    %4 = vector.broadcast %cst_7 : f32 to vector<1x16x1x4xf32>
    %c0_8 = arith.constant 0 : index
    %c1 = arith.constant 1 : index
    %c7 = arith.constant 7 : index
    %c0_9 = arith.constant 0 : index
    %5 = vector.load %arg9[%c0_8, %c1, %c7, %c0_9] : memref<1x18x25x4xf32, #tpu.memory_space<vmem>>, vector<1x16x1x4xf32>
    tpu.vector_store %arg9[%c0_8, %c1, %c7, %c0_9], %4 {strides = array<i32>} : memref<1x18x25x4xf32, #tpu.memory_space<vmem>>, vector<1x16x1x4xf32>,
    %cst_10 = arith.constant 0.000000e+00 : f32
    %6 = vector.broadcast %cst_10 : f32 to vector<1x16x1x4xf32>
    %c0_11 = arith.constant 0 : index
    %c1_12 = arith.constant 1 : index
    %c24 = arith.constant 24 : index
    %c0_13 = arith.constant 0 : index
    %7 = vector.load %arg9[%c0_11, %c1_12, %c24, %c0_13] : memref<1x18x25x4xf32, #tpu.memory_space<vmem>>, vector<1x16x1x4xf32>
    tpu.vector_store %arg9[%c0_11, %c1_12, %c24, %c0_13], %6 {strides = array<i32>} : memref<1x18x25x4xf32, #tpu.memory_space<vmem>>, vector<1x16x1x4xf32>,
    %c0_14 = arith.constant 0 : index
    %c0_15 = arith.constant 0 : index
    %c0_16 = arith.constant 0 : index
    %c0_17 = arith.constant 0 : index
    %8 = vector.load %arg1[%c0_14, %c0_15, %c0_16, %c0_17] : memref<1x16x16x8xf32, #tpu.memory_space<vmem>>, vector<1x16x16x8xf32>
    %9 = vector.extract_strided_slice %8 {offsets = [0, 0, 0, 0], sizes = [1, 16, 16, 4], strides = [1, 1, 1, 1]} : vector<1x16x16x8xf32> to vector<1x16x16x4xf32>
    %10 = vector.shape_cast %8 : vector<1x16x16x8xf32> to vector<256x8xf32>
    %c0_18 = arith.constant 0 : index
    %c0_19 = arith.constant 0 : index
    %11 = vector.load %arg2[%c0_18, %c0_19] : memref<8x4xf32, #tpu.memory_space<vmem>>, vector<8x4xf32>
    %cst_20 = arith.constant dense<0.000000e+00> : vector<256x4xf32>
    %12 = tpu.matmul %10, %11, %cst_20 {dimension_numbers = #tpu.dot_dimension_numbers<[1], [0], [0], [1], [0, 0, 1, 1], [], []>} : vector<256x8xf32>, vector<8x4xf32>, vector<256x4xf32> -> vector<256x4xf32>
    %c0_21 = arith.constant 0 : index
    %c0_22 = arith.constant 0 : index
    %13 = vector.load %arg3[%c0_21, %c0_22] : memref<1x4xf32, #tpu.memory_space<vmem>>, vector<1x4xf32>
    %14 = vector.broadcast %13 : vector<1x4xf32> to vector<256x4xf32>
    %15 = arith.addf %12, %14 : vector<256x4xf32>
    %cst_23 = arith.constant 0.000000e+00 : f32
    %16 = vector.broadcast %cst_23 : f32 to vector<256x4xf32>
    %17 = arith.maximumf %15, %16 : vector<256x4xf32>
    %18 = vector.shape_cast %17 : vector<256x4xf32> to vector<1x16x16x4xf32>
    %c0_24 = arith.constant 0 : index
    %c1_25 = arith.constant 1 : index
    %c8 = arith.constant 8 : index
    %c0_26 = arith.constant 0 : index
    %19 = vector.load %arg9[%c0_24, %c1_25, %c8, %c0_26] : memref<1x18x25x4xf32, #tpu.memory_space<vmem>>, vector<1x16x16x4xf32>
    tpu.vector_store %arg9[%c0_24, %c1_25, %c8, %c0_26], %18 {strides = array<i32>} : memref<1x18x25x4xf32, #tpu.memory_space<vmem>>, vector<1x16x16x4xf32>,
    %cst_27 = arith.constant 0.000000e+00 : f32
    %20 = vector.broadcast %cst_27 : f32 to vector<1x16x16x4xf32>
    %c0_28 = arith.constant 0 : index
    %c0_29 = arith.constant 0 : index
    %c7_30 = arith.constant 7 : index
    %c0_31 = arith.constant 0 : index
    %21 = vector.load %arg9[%c0_28, %c0_29, %c7_30, %c0_31] : memref<1x18x25x4xf32, #tpu.memory_space<vmem>>, vector<1x16x16x4xf32>
    %c0_32 = arith.constant 0 : index
    %c0_33 = arith.constant 0 : index
    %22 = vector.load %arg4[%c0_32, %c0_33] : memref<9x4xf32, #tpu.memory_space<vmem>>, vector<1x4xf32>
    %23 = vector.shape_cast %22 : vector<1x4xf32> to vector<4xf32>
    %24 = vector.shape_cast %23 : vector<4xf32> to vector<1x1x1x4xf32>
    %25 = vector.broadcast %24 : vector<1x1x1x4xf32> to vector<1x16x16x4xf32>
    %26 = arith.mulf %21, %25 : vector<1x16x16x4xf32>
    %27 = arith.addf %20, %26 : vector<1x16x16x4xf32>
    %c0_34 = arith.constant 0 : index
    %c0_35 = arith.constant 0 : index
    %c8_36 = arith.constant 8 : index
    %c0_37 = arith.constant 0 : index
    %28 = vector.load %arg9[%c0_34, %c0_35, %c8_36, %c0_37] : memref<1x18x25x4xf32, #tpu.memory_space<vmem>>, vector<1x16x16x4xf32>
    %c1_38 = arith.constant 1 : index
    %c0_39 = arith.constant 0 : index
    %29 = vector.load %arg4[%c1_38, %c0_39] : memref<9x4xf32, #tpu.memory_space<vmem>>, vector<1x4xf32>
    %30 = vector.shape_cast %29 : vector<1x4xf32> to vector<4xf32>
    %31 = vector.shape_cast %30 : vector<4xf32> to vector<1x1x1x4xf32>
    %32 = vector.broadcast %31 : vector<1x1x1x4xf32> to vector<1x16x16x4xf32>
    %33 = arith.mulf %28, %32 : vector<1x16x16x4xf32>
    %34 = arith.addf %27, %33 : vector<1x16x16x4xf32>
    %c0_40 = arith.constant 0 : index
    %c0_41 = arith.constant 0 : index
    %c9 = arith.constant 9 : index
    %c0_42 = arith.constant 0 : index
    %35 = vector.load %arg9[%c0_40, %c0_41, %c9, %c0_42] : memref<1x18x25x4xf32, #tpu.memory_space<vmem>>, vector<1x16x16x4xf32>
    %c2 = arith.constant 2 : index
    %c0_43 = arith.constant 0 : index
    %36 = vector.load %arg4[%c2, %c0_43] : memref<9x4xf32, #tpu.memory_space<vmem>>, vector<1x4xf32>
    %37 = vector.shape_cast %36 : vector<1x4xf32> to vector<4xf32>
    %38 = vector.shape_cast %37 : vector<4xf32> to vector<1x1x1x4xf32>
    %39 = vector.broadcast %38 : vector<1x1x1x4xf32> to vector<1x16x16x4xf32>
    %40 = arith.mulf %35, %39 : vector<1x16x16x4xf32>
    %41 = arith.addf %34, %40 : vector<1x16x16x4xf32>
    %c0_44 = arith.constant 0 : index
    %c1_45 = arith.constant 1 : index
    %c7_46 = arith.constant 7 : index
    %c0_47 = arith.constant 0 : index
    %42 = vector.load %arg9[%c0_44, %c1_45, %c7_46, %c0_47] : memref<1x18x25x4xf32, #tpu.memory_space<vmem>>, vector<1x16x16x4xf32>
    %c3 = arith.constant 3 : index
    %c0_48 = arith.constant 0 : index
    %43 = vector.load %arg4[%c3, %c0_48] : memref<9x4xf32, #tpu.memory_space<vmem>>, vector<1x4xf32>
    %44 = vector.shape_cast %43 : vector<1x4xf32> to vector<4xf32>
    %45 = vector.shape_cast %44 : vector<4xf32> to vector<1x1x1x4xf32>
    %46 = vector.broadcast %45 : vector<1x1x1x4xf32> to vector<1x16x16x4xf32>
    %47 = arith.mulf %42, %46 : vector<1x16x16x4xf32>
    %48 = arith.addf %41, %47 : vector<1x16x16x4xf32>
    %c0_49 = arith.constant 0 : index
    %c1_50 = arith.constant 1 : index
    %c8_51 = arith.constant 8 : index
    %c0_52 = arith.constant 0 : index
    %49 = vector.load %arg9[%c0_49, %c1_50, %c8_51, %c0_52] : memref<1x18x25x4xf32, #tpu.memory_space<vmem>>, vector<1x16x16x4xf32>
    %c4 = arith.constant 4 : index
    %c0_53 = arith.constant 0 : index
    %50 = vector.load %arg4[%c4, %c0_53] : memref<9x4xf32, #tpu.memory_space<vmem>>, vector<1x4xf32>
    %51 = vector.shape_cast %50 : vector<1x4xf32> to vector<4xf32>
    %52 = vector.shape_cast %51 : vector<4xf32> to vector<1x1x1x4xf32>
    %53 = vector.broadcast %52 : vector<1x1x1x4xf32> to vector<1x16x16x4xf32>
    %54 = arith.mulf %49, %53 : vector<1x16x16x4xf32>
    %55 = arith.addf %48, %54 : vector<1x16x16x4xf32>
    %c0_54 = arith.constant 0 : index
    %c1_55 = arith.constant 1 : index
    %c9_56 = arith.constant 9 : index
    %c0_57 = arith.constant 0 : index
    %56 = vector.load %arg9[%c0_54, %c1_55, %c9_56, %c0_57] : memref<1x18x25x4xf32, #tpu.memory_space<vmem>>, vector<1x16x16x4xf32>
    %c5 = arith.constant 5 : index
    %c0_58 = arith.constant 0 : index
    %57 = vector.load %arg4[%c5, %c0_58] : memref<9x4xf32, #tpu.memory_space<vmem>>, vector<1x4xf32>
    %58 = vector.shape_cast %57 : vector<1x4xf32> to vector<4xf32>
    %59 = vector.shape_cast %58 : vector<4xf32> to vector<1x1x1x4xf32>
    %60 = vector.broadcast %59 : vector<1x1x1x4xf32> to vector<1x16x16x4xf32>
    %61 = arith.mulf %56, %60 : vector<1x16x16x4xf32>
    %62 = arith.addf %55, %61 : vector<1x16x16x4xf32>
    %c0_59 = arith.constant 0 : index
    %c2_60 = arith.constant 2 : index
    %c7_61 = arith.constant 7 : index
    %c0_62 = arith.constant 0 : index
    %63 = vector.load %arg9[%c0_59, %c2_60, %c7_61, %c0_62] : memref<1x18x25x4xf32, #tpu.memory_space<vmem>>, vector<1x16x16x4xf32>
    %c6 = arith.constant 6 : index
    %c0_63 = arith.constant 0 : index
    %64 = vector.load %arg4[%c6, %c0_63] : memref<9x4xf32, #tpu.memory_space<vmem>>, vector<1x4xf32>
    %65 = vector.shape_cast %64 : vector<1x4xf32> to vector<4xf32>
    %66 = vector.shape_cast %65 : vector<4xf32> to vector<1x1x1x4xf32>
    %67 = vector.broadcast %66 : vector<1x1x1x4xf32> to vector<1x16x16x4xf32>
    %68 = arith.mulf %63, %67 : vector<1x16x16x4xf32>
    %69 = arith.addf %62, %68 : vector<1x16x16x4xf32>
    %c0_64 = arith.constant 0 : index
    %c2_65 = arith.constant 2 : index
    %c8_66 = arith.constant 8 : index
    %c0_67 = arith.constant 0 : index
    %70 = vector.load %arg9[%c0_64, %c2_65, %c8_66, %c0_67] : memref<1x18x25x4xf32, #tpu.memory_space<vmem>>, vector<1x16x16x4xf32>
    %c7_68 = arith.constant 7 : index
    %c0_69 = arith.constant 0 : index
    %71 = vector.load %arg4[%c7_68, %c0_69] : memref<9x4xf32, #tpu.memory_space<vmem>>, vector<1x4xf32>
    %72 = vector.shape_cast %71 : vector<1x4xf32> to vector<4xf32>
    %73 = vector.shape_cast %72 : vector<4xf32> to vector<1x1x1x4xf32>
    %74 = vector.broadcast %73 : vector<1x1x1x4xf32> to vector<1x16x16x4xf32>
    %75 = arith.mulf %70, %74 : vector<1x16x16x4xf32>
    %76 = arith.addf %69, %75 : vector<1x16x16x4xf32>
    %c0_70 = arith.constant 0 : index
    %c2_71 = arith.constant 2 : index
    %c9_72 = arith.constant 9 : index
    %c0_73 = arith.constant 0 : index
    %77 = vector.load %arg9[%c0_70, %c2_71, %c9_72, %c0_73] : memref<1x18x25x4xf32, #tpu.memory_space<vmem>>, vector<1x16x16x4xf32>
    %c8_74 = arith.constant 8 : index
    %c0_75 = arith.constant 0 : index
    %78 = vector.load %arg4[%c8_74, %c0_75] : memref<9x4xf32, #tpu.memory_space<vmem>>, vector<1x4xf32>
    %79 = vector.shape_cast %78 : vector<1x4xf32> to vector<4xf32>
    %80 = vector.shape_cast %79 : vector<4xf32> to vector<1x1x1x4xf32>
    %81 = vector.broadcast %80 : vector<1x1x1x4xf32> to vector<1x16x16x4xf32>
    %82 = arith.mulf %77, %81 : vector<1x16x16x4xf32>
    %83 = arith.addf %76, %82 : vector<1x16x16x4xf32>
    %c0_76 = arith.constant 0 : index
    %c0_77 = arith.constant 0 : index
    %84 = vector.load %arg5[%c0_76, %c0_77] : memref<1x4xf32, #tpu.memory_space<vmem>>, vector<1x4xf32>
    %85 = vector.shape_cast %84 : vector<1x4xf32> to vector<1x1x1x4xf32>
    %86 = vector.broadcast %85 : vector<1x1x1x4xf32> to vector<1x16x16x4xf32>
    %87 = arith.addf %83, %86 : vector<1x16x16x4xf32>
    %88 = vector.shape_cast %87 : vector<1x16x16x4xf32> to vector<256x4xf32>
    %c0_78 = arith.constant 0 : index
    %c0_79 = arith.constant 0 : index
    %89 = vector.load %arg6[%c0_78, %c0_79] : memref<4x4xf32, #tpu.memory_space<vmem>>, vector<4x4xf32>
    %cst_80 = arith.constant dense<0.000000e+00> : vector<256x4xf32>
    %90 = tpu.matmul %88, %89, %cst_80 {dimension_numbers = #tpu.dot_dimension_numbers<[1], [0], [0], [1], [0, 0, 1, 1], [], []>} : vector<256x4xf32>, vector<4x4xf32>, vector<256x4xf32> -> vector<256x4xf32>
    %c0_81 = arith.constant 0 : index
    %c0_82 = arith.constant 0 : index
    %91 = vector.load %arg7[%c0_81, %c0_82] : memref<1x4xf32, #tpu.memory_space<vmem>>, vector<1x4xf32>
    %92 = vector.broadcast %91 : vector<1x4xf32> to vector<256x4xf32>
    %93 = arith.addf %90, %92 : vector<256x4xf32>
    %cst_83 = arith.constant 0.000000e+00 : f32
    %94 = vector.broadcast %cst_83 : f32 to vector<256x4xf32>
    %95 = arith.maximumf %93, %94 : vector<256x4xf32>
    %96 = vector.shape_cast %95 : vector<256x4xf32> to vector<1x16x16x4xf32>
    %97 = tpu.concatenate %9, %96 in 3 : vector<1x16x16x4xf32>, vector<1x16x16x4xf32> -> vector<1x16x16x8xf32>
    %c0_84 = arith.constant 0 : index
    %c0_85 = arith.constant 0 : index
    %c0_86 = arith.constant 0 : index
    %c0_87 = arith.constant 0 : index
    %98 = vector.load %arg8[%c0_84, %c0_85, %c0_86, %c0_87] : memref<1x16x16x8xf32, #tpu.memory_space<vmem>>, vector<1x16x16x8xf32>
    tpu.vector_store %arg8[%c0_84, %c0_85, %c0_86, %c0_87], %97 {strides = array<i32>} : memref<1x16x16x8xf32, #tpu.memory_space<vmem>>, vector<1x16x16x8xf32>,
    return
  }
  func.func @transform_0(%arg0: i32) -> (i32, i32, i32, i32) {
    %c0_i32 = arith.constant 0 : i32
    %c0_i32_0 = arith.constant 0 : i32
    %c0_i32_1 = arith.constant 0 : i32
    %c0_i32_2 = arith.constant 0 : i32
    return %arg0, %c0_i32, %c0_i32_0, %c0_i32_1 : i32, i32, i32, i32
  }
  func.func @transform_1(%arg0: i32) -> (i32, i32) {
    %c0_i32 = arith.constant 0 : i32
    %c0_i32_0 = arith.constant 0 : i32
    %c0_i32_1 = arith.constant 0 : i32
    return %c0_i32, %c0_i32_0 : i32, i32
  }
  func.func @transform_2(%arg0: i32) -> (i32, i32) {
    %c0_i32 = arith.constant 0 : i32
    %c0_i32_0 = arith.constant 0 : i32
    %c0_i32_1 = arith.constant 0 : i32
    return %c0_i32, %c0_i32_0 : i32, i32
  }
  func.func @transform_3(%arg0: i32) -> (i32, i32) {
    %c0_i32 = arith.constant 0 : i32
    %c0_i32_0 = arith.constant 0 : i32
    %c0_i32_1 = arith.constant 0 : i32
    return %c0_i32, %c0_i32_0 : i32, i32
  }
  func.func @transform_4(%arg0: i32) -> (i32, i32) {
    %c0_i32 = arith.constant 0 : i32
    %c0_i32_0 = arith.constant 0 : i32
    %c0_i32_1 = arith.constant 0 : i32
    return %c0_i32, %c0_i32_0 : i32, i32
  }
  func.func @transform_5(%arg0: i32) -> (i32, i32) {
    %c0_i32 = arith.constant 0 : i32
    %c0_i32_0 = arith.constant 0 : i32
    %c0_i32_1 = arith.constant 0 : i32
    return %c0_i32, %c0_i32_0 : i32, i32
  }
  func.func @transform_6(%arg0: i32) -> (i32, i32) {
    %c0_i32 = arith.constant 0 : i32
    %c0_i32_0 = arith.constant 0 : i32
    %c0_i32_1 = arith.constant 0 : i32
    return %c0_i32, %c0_i32_0 : i32, i32
  }
  func.func @transform_7(%arg0: i32) -> (i32, i32, i32, i32) {
    %c0_i32 = arith.constant 0 : i32
    %c0_i32_0 = arith.constant 0 : i32
    %c0_i32_1 = arith.constant 0 : i32
    %c0_i32_2 = arith.constant 0 : i32
    return %arg0, %c0_i32, %c0_i32_0, %c0_i32_1 : i32, i32, i32, i32
  }
}

</mosaic_0001>

<bundles_post_ra>
// kernel: a_call__.1
= control target key start
LH: loop header
LB: loop body
LE: loop exit
PB: predicated region body
PF: predicated region fallthrough
CT: control target
= control target key end

     0   :  { %s2668_s24 = smov 0   ;;  %s3719_s0 = inlined_call_operand.vmem [shape: f32[2,16,16,8], index: 0, kind: input, shape index: {}]   ;;  %s3720_s1 = inlined_call_operand.vmem [shape: f32[8,4], index: 1, kind: input, shape index: {}]   ;;  %s3721_s2 = inlined_call_operand.vmem [shape: f32[1,4], index: 2, kind: input, shape index: {}]   ;;  %s3722_s3 = inlined_call_operand.vmem [shape: f32[9,4], index: 3, kind: input, shape index: {}]   ;;  %s3723_s4 = inlined_call_operand.vmem [shape: f32[1,4], index: 4, kind: input, shape index: {}]   ;;  %s3724_s5 = inlined_call_operand.vmem [shape: f32[4,4], index: 5, kind: input, shape index: {}]   ;;  %s3725_s6 = inlined_call_operand.vmem [shape: f32[1,4], index: 6, kind: input, shape index: {}]   ;;  %s3726_s7 = inlined_call_operand.vmem [shape: f32[2,16,16,8], index: 7, kind: output, shape index: {}]  }
   0x1 LB: > { %s2310_s25 = sadd.s32 4294967295, %s2624_s24   ;;  %p2314_p0 = scmp.ge.s32.totalorder %s2624_s24, 1  ;;  %s2624_s24 = sphi %s2668_s24, %s17_s24  }
   0x2   : > { %p237_p1 = scmp.lt.s32.totalorder %s2624_s24, 3 }
   0x4   : > { %p238_p2 = pnand %p2314_p0, %p237_p1 }
   0x5   : > { %v355_v0 = vld [vmem:[%s3720_s1] sm:$0xff] (!%p238_p2)  ;;  %p269_p3 = scmp.lt.s32.totalorder (!%p238_p2), %s2310_s25, 1  ;;  %vm363_vm0 = vcmask (!%p238_p2), 64512   ;;  %vm279_vm1 = vcmask (!%p238_p2), 31744   ;;  %v2626_v33 = vmov (!%p238_p2), 0.0   ;;  %vm283_vm2 = vcmask (!%p238_p2), 24576  }
   0x6   : > { %241 = sbr.rel (%p238_p2) target bundleno = 742 (0x2e6), region = 48  ;;  %2466 = vmatprep.subr.mxu0 (!%p238_p2), %v355_v0  ;;  %280 = vst.msk [vmem:[#allocation2] sm:$0xff] (!%p238_p2), %vm279_vm1, %v2626_v33  ;;  %281 = vst.msk [vmem:[#allocation2 + $0x8] sm:$0xff] (!%p238_p2), %vm279_vm1, %v2626_v33  ;;  %v1698_v34 = vld [vmem:[%s3724_s5] sm:$0xf] (!%p238_p2)  ;;  %vm1802_vm3 = vcmask (!%p238_p2), 1043456  }
   0x7   : > { %2467 = vmatpush3.msra.mxu0 (!%p238_p2), %v355_v0  ;;  %282 = vst.msk [vmem:[#allocation2 + $0x10] sm:$0xff] (!%p238_p2), %vm279_vm1, %v2626_v33  ;;  %286 = vst.msk [vmem:[#allocation2 + $0x220] sm:$0xff] (!%p238_p2), %vm279_vm1, %v2626_v33  ;;  %2516 = vmatprep.subr.msk.mxu1 (!%p238_p2), %vm1802_vm3, %v1698_v34  ;;  %v2799_v35 = vld [vmem:[%s3721_s2] ss:$0 sm:$0xff] (!%p238_p2)  ;;  %v2810_v42 = vld [vmem:[%s3722_s3 + $0x1] ss:$0 sm:$0xff] (!%p238_p2) }
   0x8   : > { %287 = vst.msk [vmem:[#allocation2 + $0x228] sm:$0xff] (!%p238_p2), %vm279_vm1, %v2626_v33  ;;  %288 = vst.msk [vmem:[#allocation2 + $0x230] sm:$0xff] (!%p238_p2), %vm279_vm1, %v2626_v33  ;;  %2517 = vmatpush3.msk.msra.mxu1 (!%p238_p2), %vm1802_vm3, %v1698_v34  ;;  %v2805_v40 = vld [vmem:[%s3722_s3] ss:$0 sm:$0xff] (!%p238_p2)  ;;  %v2820_v54 = vld [vmem:[%s3722_s3 + $0x2] ss:$0 sm:$0xff] (!%p238_p2) }
   0x9   : > { %291 = vst.msk [vmem:[#allocation2 + $0x27] sm:$0x1] (!%p238_p2), %vm283_vm2, %v2626_v33  ;;  %292 = vst.msk [vmem:[#allocation2 + $0x47] sm:$0x1] (!%p238_p2), %vm283_vm2, %v2626_v33  ;;  %v2873_v34 = vld [vmem:[%s3722_s3 + $0x6] ss:$0 sm:$0xff] (!%p238_p2) }
   0xa   : > { %284 = vst.msk [vmem:[#allocation2 + $0x18] sm:$0x1] (!%p238_p2), %vm283_vm2, %v2626_v33  ;;  %289 = vst.msk [vmem:[#allocation2 + $0x238] sm:$0x1] (!%p238_p2), %vm283_vm2, %v2626_v33  ;;  %s2627_s17 = smov (!%p238_p2), 4  }
   0xb   : > { %293 = vst.msk [vmem:[#allocation2 + $0x67] sm:$0x1] (!%p238_p2), %vm283_vm2, %v2626_v33  ;;  %294 = vst.msk [vmem:[#allocation2 + $0x87] sm:$0x1] (!%p238_p2), %vm283_vm2, %v2626_v33 }
   0xc   : > { %295 = vst.msk [vmem:[#allocation2 + $0xa7] sm:$0x1] (!%p238_p2), %vm283_vm2, %v2626_v33  ;;  %296 = vst.msk [vmem:[#allocation2 + $0xc7] sm:$0x1] (!%p238_p2), %vm283_vm2, %v2626_v33 }
   0xd   : > { %s3728_s25 = smov (!%p269_p3, %s2310_s25), 1  ;;  %297 = vst.msk [vmem:[#allocation2 + $0xe7] sm:$0x1] %vm283_vm2, %v2626_v33  ;;  %298 = vst.msk [vmem:[#allocation2 + $0x107] sm:$0x1] %vm283_vm2, %v2626_v33  ;;  %v749_v37 = vld [vmem:[#allocation2 + $0x7] sm:$0xff] }
   0xe   : > { %s2398_s28 = sshll.u32 %s3728_s25, 8  ;;  %299 = vst.msk [vmem:[#allocation2 + $0x127] sm:$0x1] %vm283_vm2, %v2626_v33  ;;  %300 = vst.msk [vmem:[#allocation2 + $0x147] sm:$0x1] %vm283_vm2, %v2626_v33  ;;  %v850_v41 = vld [vmem:[#allocation2 + $0x8] sm:$0xff]  ;;  %v786_v49 = vmul.f32 %v2805_v40, %v749_v37 }
   0xf   : > { %s2687_s8 = scalar_lea.vmem %s3719_s0, %s2398_s28  ;;  %301 = vst.msk [vmem:[#allocation2 + $0x167] sm:$0x1] %vm283_vm2, %v2626_v33  ;;  %302 = vst.msk [vmem:[#allocation2 + $0x187] sm:$0x1] %vm283_vm2, %v2626_v33  ;;  %v750_v44 = vld [vmem:[#allocation2 + $0xf] sm:$0xff]  ;;  %v887_v50 = vmul.f32 %v2810_v42, %v850_v41  ;;  %s3570_s20 = scalar_lea.vmem %s3726_s7, %s2398_s28 }
  0x10   : > { %v323_v1 = vld [vmem:[%s2687_s8] sm:$0xff]  ;;  %v324_v2 = vld [vmem:[%s2687_s8 + $0x8] sm:$0xff]  ;;  %v325_v3 = vld [vmem:[%s2687_s8 + $0x10] sm:$0xff]  ;;  %303 = vst.msk [vmem:[#allocation2 + $0x1a7] sm:$0x1] %vm283_vm2, %v2626_v33  ;;  %v787_v55 = vmul.f32 %v2805_v40, %v750_v44 }
  0x11   : > { %2468 = vmatprep.mubr.msk.f32.mxu0 %vm363_vm0, %v323_v1  ;;  %v326_v4 = vld [vmem:[%s2687_s8 + $0x18] sm:$0xff]  ;;  %v327_v5 = vld [vmem:[%s2687_s8 + $0x20] sm:$0xff]  ;;  %v328_v6 = vld [vmem:[%s2687_s8 + $0x28] sm:$0xff]  ;;  %304 = vst.msk [vmem:[#allocation2 + $0x1c7] sm:$0x1] %vm283_vm2, %v2626_v33  ;;  %v919_v62 = vadd.f32 %v887_v50, %v786_v49 }
  0x12   : > { %2469 = vmatmul.mubr.msk.f32.vlgmr.msra.gmra.mrb[0].mxu0 %vm363_vm0, %v324_v2  ;;  %v329_v7 = vld [vmem:[%s2687_s8 + $0x30] sm:$0xff]  ;;  %v330_v8 = vld [vmem:[%s2687_s8 + $0x38] sm:$0xff]  ;;  %v331_v9 = vld [vmem:[%s2687_s8 + $0x40] sm:$0xff]  ;;  %305 = vst.msk [vmem:[#allocation2 + $0x1e7] sm:$0x1] %vm283_vm2, %v2626_v33 }
  0x13   : > { %2471 = vmatprep.mubr.msk.f32.mxu0 %vm363_vm0, %v325_v3  ;;  %v332_v10 = vld [vmem:[%s2687_s8 + $0x48] sm:$0xff]  ;;  %v333_v11 = vld [vmem:[%s2687_s8 + $0x50] sm:$0xff]  ;;  %v334_v12 = vld [vmem:[%s2687_s8 + $0x58] sm:$0xff]  ;;  %306 = vst.msk [vmem:[#allocation2 + $0x207] sm:$0x1] %vm283_vm2, %v2626_v33 }
  0x14   : > { %v335_v13 = vld [vmem:[%s2687_s8 + $0x60] sm:$0xff]  ;;  %v336_v14 = vld [vmem:[%s2687_s8 + $0x68] sm:$0xff]  ;;  %v337_v15 = vld [vmem:[%s2687_s8 + $0x70] sm:$0xff]  ;;  %307 = vst.msk [vmem:[#allocation2 + $0x38] sm:$0x1] %vm283_vm2, %v2626_v33 }
  0x15   : > { %v338_v16 = vld [vmem:[%s2687_s8 + $0x78] sm:$0xff]  ;;  %v339_v17 = vld [vmem:[%s2687_s8 + $0x80] sm:$0xff]  ;;  %v340_v18 = vld [vmem:[%s2687_s8 + $0x88] sm:$0xff]  ;;  %308 = vst.msk [vmem:[#allocation2 + $0x58] sm:$0x1] %vm283_vm2, %v2626_v33 }
  0x16   : > { %2472 = vmatmul.mubr.msk.f32.gmra.mrb[2].mxu0 %vm363_vm0, %v326_v4  ;;  %v341_v19 = vld [vmem:[%s2687_s8 + $0x90] sm:$0xff]  ;;  %v342_v20 = vld [vmem:[%s2687_s8 + $0x98] sm:$0xff]  ;;  %v343_v21 = vld [vmem:[%s2687_s8 + $0xa0] sm:$0xff]  ;;  %309 = vst.msk [vmem:[#allocation2 + $0x78] sm:$0x1] %vm283_vm2, %v2626_v33 }
  0x17   : > { %2474 = vmatprep.mubr.msk.f32.mxu0 %vm363_vm0, %v327_v5  ;;  %v344_v22 = vld [vmem:[%s2687_s8 + $0xa8] sm:$0xff]  ;;  %v345_v23 = vld [vmem:[%s2687_s8 + $0xb0] sm:$0xff]  ;;  %v346_v24 = vld [vmem:[%s2687_s8 + $0xb8] sm:$0xff]  ;;  %310 = vst.msk [vmem:[#allocation2 + $0x98] sm:$0x1] %vm283_vm2, %v2626_v33 }
  0x18   : > { %v347_v25 = vld [vmem:[%s2687_s8 + $0xc0] sm:$0xff]  ;;  %v348_v26 = vld [vmem:[%s2687_s8 + $0xc8] sm:$0xff]  ;;  %v349_v27 = vld [vmem:[%s2687_s8 + $0xd0] sm:$0xff]  ;;  %311 = vst.msk [vmem:[#allocation2 + $0xb8] sm:$0x1] %vm283_vm2, %v2626_v33 }
  0x19   : > { %v350_v28 = vld [vmem:[%s2687_s8 + $0xd8] sm:$0xff]  ;;  %v351_v29 = vld [vmem:[%s2687_s8 + $0xe0] sm:$0xff]  ;;  %v352_v30 = vld [vmem:[%s2687_s8 + $0xe8] sm:$0xff]  ;;  %312 = vst.msk [vmem:[#allocation2 + $0xd8] sm:$0x1] %vm283_vm2, %v2626_v33 }
  0x1a   : > { %2475 = vmatmul.mubr.msk.f32.gmra.mrb[4].mxu0 %vm363_vm0, %v328_v6  ;;  %v353_v31 = vld [vmem:[%s2687_s8 + $0xf0] sm:$0xff]  ;;  %v354_v32 = vld [vmem:[%s2687_s8 + $0xf8] sm:$0xff]  ;;  %313 = vst.msk [vmem:[#allocation2 + $0xf8] sm:$0x1] %vm283_vm2, %v2626_v33  ;;  %314 = vst.msk [vmem:[#allocation2 + $0x118] sm:$0x1] %vm283_vm2, %v2626_v33 }
  0x1b   : > { %2477 = vmatprep.mubr.msk.f32.mxu0 %vm363_vm0, %v329_v7  ;;  %315 = vst.msk [vmem:[#allocation2 + $0x138] sm:$0x1] %vm283_vm2, %v2626_v33  ;;  %316 = vst.msk [vmem:[#allocation2 + $0x158] sm:$0x1] %vm283_vm2, %v2626_v33  ;;  %v851_v45 = vld [vmem:[#allocation2 + $0x10] sm:$0xff] }
  0x1c   : > { %317 = vst.msk [vmem:[#allocation2 + $0x178] sm:$0x1] %vm283_vm2, %v2626_v33  ;;  %318 = vst.msk [vmem:[#allocation2 + $0x198] sm:$0x1] %vm283_vm2, %v2626_v33  ;;  %v951_v53 = vld [vmem:[#allocation2 + $0x9] sm:$0xff]  ;;  %v888_v56 = vmul.f32 %v2810_v42, %v851_v45  ;;  %v952_v58 = vld [vmem:[#allocation2 + $0x11] sm:$0xff] }
  0x1d   : > { %319 = vst.msk [vmem:[#allocation2 + $0x1b8] sm:$0x1] %vm283_vm2, %v2626_v33  ;;  %320 = vst.msk [vmem:[#allocation2 + $0x1d8] sm:$0x1] %vm283_vm2, %v2626_v33  ;;  %v988_v63 = vmul.f32 %v2820_v54, %v951_v53  ;;  %v989_v3 = vmul.f32 %v2820_v54, %v952_v58  ;;  %v2835_v5 = vld [vmem:[%s3722_s3 + $0x4] ss:$0 sm:$0xff] }
  0x1e   : > { %2478 = vmatmul.mubr.msk.f32.gmra.mrb[6].mxu0 %vm363_vm0, %v330_v8  ;;  %321 = vst.msk [vmem:[#allocation2 + $0x1f8] sm:$0x1] %vm283_vm2, %v2626_v33  ;;  %322 = vst.msk [vmem:[#allocation2 + $0x218] sm:$0x1] %vm283_vm2, %v2626_v33  ;;  %v920_v2 = vadd.f32 %v888_v56, %v787_v55  ;;  %v2840_v7 = vld [vmem:[%s3722_s3 + $0x3] ss:$0 sm:$0xff] }
  0x1f   : > { %2480 = vmatprep.mubr.msk.f32.mxu0 %vm363_vm0, %v331_v9  ;;  %v2845_v8 = vld [vmem:[%s3722_s3 + $0x5] ss:$0 sm:$0xff] }
  0x22   : > { %2481 = vmatmul.mubr.msk.f32.gmra.mrb[8].mxu0 %vm363_vm0, %v332_v10 }
  0x23   : > { %2483 = vmatprep.mubr.msk.f32.mxu0 %vm363_vm0, %v333_v11  ;;  %v1020_v11 = vadd.f32 %v988_v63, %v919_v62 }
  0x26   : > { %2484 = vmatmul.mubr.msk.f32.gmra.mrb[10].mxu0 %vm363_vm0, %v334_v12 }
  0x27   : > { %2486 = vmatprep.mubr.msk.f32.mxu0 %vm363_vm0, %v335_v13 }
  0x2a   : > { %2487 = vmatmul.mubr.msk.f32.gmra.mrb[12].mxu0 %vm363_vm0, %v336_v14 }
  0x2b   : > { %2489 = vmatprep.mubr.msk.f32.mxu0 %vm363_vm0, %v337_v15 }
  0x2e   : > { %2490 = vmatmul.mubr.msk.f32.gmra.mrb[14].mxu0 %vm363_vm0, %v338_v16 }
  0x2f   : > { %2492 = vmatprep.mubr.msk.f32.mxu0 %vm363_vm0, %v339_v17 }
  0x32   : > { %2493 = vmatmul.mubr.msk.f32.gmra.mrb[16].mxu0 %vm363_vm0, %v340_v18  ;;  %v1021_v18 = vadd.f32 %v989_v3, %v920_v2 }
  0x33   : > { %2495 = vmatprep.mubr.msk.f32.mxu0 %vm363_vm0, %v341_v19 }
  0x36   : > { %2496 = vmatmul.mubr.msk.f32.gmra.mrb[18].mxu0 %vm363_vm0, %v342_v20 }
  0x37   : > { %2498 = vmatprep.mubr.msk.f32.mxu0 %vm363_vm0, %v343_v21 }
  0x3a   : > { %2499 = vmatmul.mubr.msk.f32.gmra.mrb[20].mxu0 %vm363_vm0, %v344_v22 }
  0x3b   : > { %2501 = vmatprep.mubr.msk.f32.mxu0 %vm363_vm0, %v345_v23 }
  0x3e   : > { %2502 = vmatmul.mubr.msk.f32.gmra.mrb[22].mxu0 %vm363_vm0, %v346_v24 }
  0x3f   : > { %2504 = vmatprep.mubr.msk.f32.mxu0 %vm363_vm0, %v347_v25 }
  0x42   : > { %2505 = vmatmul.mubr.msk.f32.gmra.mrb[24].mxu0 %vm363_vm0, %v348_v26 }
  0x43   : > { %2507 = vmatprep.mubr.msk.f32.mxu0 %vm363_vm0, %v349_v27  ;;  %v2861_v27 = vld [vmem:[%s3722_s3 + $0x7] ss:$0 sm:$0xff] }
  0x46   : > { %2508 = vmatmul.mubr.msk.f32.gmra.mrb[26].mxu0 %vm363_vm0, %v350_v28  ;;  %v2866_v28 = vld [vmem:[%s3722_s3 + $0x8] ss:$0 sm:$0xff] }
  0x47   : > { %2510 = vmatprep.mubr.msk.f32.mxu0 %vm363_vm0, %v351_v29 }
  0x4a   : > { %2511 = vmatmul.mubr.msk.f32.gmra.mrb[28].mxu0 %vm363_vm0, %v352_v30 }
  0x4b   : > { %2513 = vmatprep.mubr.msk.f32.mxu0 %vm363_vm0, %v353_v31 }
  0x4e   : > { %2514 = vmatmul.mubr.msk.f32.gmra.mrb[30].mxu0 %vm363_vm0, %v354_v32 }
  0xe5   : > { %v2470_v36 = vpop.f32.mrb[0].mxu0 }
  0xe6   : > { %v532_v38 = vadd.f32 %v2470_v36, %v2799_v35  ;;  %v526_v39 = vpop.f32.mrb[1].mxu0 }
  0xe7   : > { %v527_v43 = vadd.f32 %v2799_v35, %v526_v39 }
  0xe8   : > { %v686_v46 = vmax.f32 %v532_v38, 0.0 }
  0xe9   : > { %v685_v47 = vmax.f32 %v527_v43, 0.0  ;;  %v2473_v48 = vpop.f32.mrb[2].mxu0 }
  0xea   : > { %718 = vst.msk [vmem:[#allocation2 + $0x30] sm:$0xff] %vm279_vm1, %v686_v46  ;;  %v542_v51 = vadd.f32 %v2473_v48, %v2799_v35  ;;  %v536_v52 = vpop.f32.mrb[3].mxu0 }
  0xeb   : > { %717 = vst.msk [vmem:[#allocation2 + $0x28] sm:$0xff] %vm279_vm1, %v685_v47  ;;  %v537_v57 = vadd.f32 %v2799_v35, %v536_v52 }
  0xec   : > { %v688_v59 = vmax.f32 %v542_v51, 0.0 }
  0xed   : > { %v687_v60 = vmax.f32 %v537_v57, 0.0  ;;  %v2476_v61 = vpop.f32.mrb[4].mxu0 }
  0xee   : > { %720 = vst.msk [vmem:[#allocation2 + $0x50] sm:$0xff] %vm279_vm1, %v688_v59  ;;  %v552_v0 = vadd.f32 %v2476_v61, %v2799_v35  ;;  %v546_v1 = vpop.f32.mrb[5].mxu0 }
  0xef   : > { %719 = vst.msk [vmem:[#allocation2 + $0x48] sm:$0xff] %vm279_vm1, %v687_v60  ;;  %v547_v4 = vadd.f32 %v2799_v35, %v546_v1 }
  0xf0   : > { %v690_v6 = vmax.f32 %v552_v0, 0.0 }
  0xf1   : > { %v689_v9 = vmax.f32 %v547_v4, 0.0  ;;  %v2479_v10 = vpop.f32.mrb[6].mxu0  ;;  %v1154_v12 = vld [vmem:[#allocation2 + $0x30] sm:$0xff] }
  0xf2   : > { %v2847_v13 = vld [vmem:[#allocation2 + $0x31] sm:$0xff]  ;;  %722 = vst.msk [vmem:[#allocation2 + $0x70] sm:$0xff] %vm279_vm1, %v690_v6  ;;  %v562_v14 = vadd.f32 %v2479_v10, %v2799_v35  ;;  %v556_v15 = vpop.f32.mrb[7].mxu0  ;;  %v1052_v16 = vld [vmem:[#allocation2 + $0x27] sm:$0xff]  ;;  %v1191_v23 = vmul.f32 %v2835_v5, %v1154_v12  ;;  %v890_v30 = vmul.f32 %v2810_v42, %v1154_v12 }
  0xf3   : > { %v1153_v17 = vld [vmem:[#allocation2 + $0x28] sm:$0xff]  ;;  %721 = vst.msk [vmem:[#allocation2 + $0x68] sm:$0xff] %vm279_vm1, %v689_v9  ;;  %v557_v19 = vadd.f32 %v2799_v35, %v556_v15  ;;  %v1089_v20 = vmul.f32 %v2840_v7, %v1052_v16  ;;  %v1292_v24 = vmul.f32 %v2845_v8, %v2847_v13  ;;  %v788_v38 = vmul.f32 %v2805_v40, %v1052_v16 }
  0xf4   : > { %v1254_v21 = vld [vmem:[#allocation2 + $0x29] sm:$0xff]  ;;  %v692_v25 = vmax.f32 %v562_v14, 0.0  ;;  %v1190_v26 = vmul.f32 %v2835_v5, %v1153_v17  ;;  %v889_v39 = vmul.f32 %v2810_v42, %v1153_v17 }
  0xf5   : > { %v1053_v22 = vld [vmem:[#allocation2 + $0x2f] sm:$0xff]  ;;  %v691_v31 = vmax.f32 %v557_v19, 0.0  ;;  %v2482_v32 = vpop.f32.mrb[8].mxu0  ;;  %v1121_v33 = vadd.f32 %v1089_v20, %v1020_v11  ;;  %v1291_v44 = vmul.f32 %v2845_v8, %v1254_v21  ;;  %v990_v47 = vmul.f32 %v2820_v54, %v1254_v21 }
  0xf6   : > { %v1090_v29 = vmul.f32 %v2840_v7, %v1053_v22  ;;  %v2875_v36 = vld [vmem:[#allocation2 + $0x50] sm:$0xff]  ;;  %724 = vst.msk [vmem:[#allocation2 + $0x90] sm:$0xff] %vm279_vm1, %v692_v25  ;;  %v572_v41 = vadd.f32 %v2482_v32, %v2799_v35  ;;  %v566_v43 = vpop.f32.mrb[9].mxu0  ;;  %v2884_v45 = vld [vmem:[#allocation2 + $0x47] sm:$0xff]  ;;  %v789_v53 = vmul.f32 %v2805_v40, %v1053_v22  ;;  %v921_v63 = vadd.f32 %v889_v39, %v788_v38 }
  0xf7   : > { %v2877_v37 = vld [vmem:[#allocation2 + $0x51] sm:$0xff]  ;;  %723 = vst.msk [vmem:[#allocation2 + $0x88] sm:$0xff] %vm279_vm1, %v691_v31  ;;  %v567_v48 = vadd.f32 %v2799_v35, %v566_v43  ;;  %v1222_v49 = vadd.f32 %v1190_v26, %v1121_v33  ;;  %v2889_v50 = vld [vmem:[#allocation2 + $0x48] sm:$0xff]  ;;  %v1495_v52 = vmul.f32 %v2861_v27, %v2875_v36  ;;  %v1393_v56 = vmul.f32 %v2873_v34, %v2884_v45  ;;  %v2925_v26 = vld [vmem:[%s3723_s4] ss:$0 sm:$0xff] }
  0xf8   : > { %v1122_v46 = vadd.f32 %v1090_v29, %v1021_v18  ;;  %v2891_v51 = vld [vmem:[#allocation2 + $0x4f] sm:$0xff]  ;;  %v694_v55 = vmax.f32 %v572_v41, 0.0  ;;  %v1596_v59 = vmul.f32 %v2866_v28, %v2877_v37  ;;  %v1091_v0 = vmul.f32 %v2840_v7, %v2884_v45 }
  0xf9   : > { %v2898_v57 = vld [vmem:[#allocation2 + $0x49] sm:$0xff]  ;;  %v693_v60 = vmax.f32 %v567_v48, 0.0  ;;  %v2485_v61 = vpop.f32.mrb[10].mxu0  ;;  %v1323_v62 = vadd.f32 %v1291_v44, %v1222_v49  ;;  %v1494_v3 = vmul.f32 %v2861_v27, %v2889_v50  ;;  %v1394_v6 = vmul.f32 %v2873_v34, %v2891_v51 }
  0xfa   : > { %v1223_v58 = vadd.f32 %v1191_v23, %v1122_v46  ;;  %726 = vst.msk [vmem:[#allocation2 + $0xb0] sm:$0xff] %vm279_vm1, %v694_v55  ;;  %v582_v1 = vadd.f32 %v2485_v61, %v2799_v35  ;;  %v576_v2 = vpop.f32.mrb[11].mxu0  ;;  %v1595_v11 = vmul.f32 %v2866_v28, %v2898_v57  ;;  %v1022_v12 = vadd.f32 %v990_v47, %v921_v63  ;;  %v2918_v18 = vld [vmem:[#allocation2 + $0x67] sm:$0xff] }
  0xfb   : > { %725 = vst.msk [vmem:[#allocation2 + $0xa8] sm:$0xff] %vm279_vm1, %v693_v60  ;;  %v577_v9 = vadd.f32 %v2799_v35, %v576_v2  ;;  %v1425_v10 = vadd.f32 %v1393_v56, %v1323_v62  ;;  %v1192_v16 = vmul.f32 %v2835_v5, %v2889_v50  ;;  %v1293_v17 = vmul.f32 %v2845_v8, %v2898_v57  ;;  %v2927_v31 = vld [vmem:[#allocation2 + $0x68] sm:$0xff] }
  0xfc   : > { %v1324_v4 = vadd.f32 %v1292_v24, %v1223_v58  ;;  %v696_v14 = vmax.f32 %v582_v1, 0.0  ;;  %v1123_v22 = vadd.f32 %v1091_v0, %v1022_v12  ;;  %v922_v23 = vadd.f32 %v890_v30, %v789_v53  ;;  %v2940_v53 = vld [vmem:[#allocation2 + $0x6f] sm:$0xff] }
  0xfd   : > { %v695_v19 = vmax.f32 %v577_v9, 0.0  ;;  %v2488_v20 = vpop.f32.mrb[12].mxu0  ;;  %v1526_v21 = vadd.f32 %v1494_v3, %v1425_v10  ;;  %v991_v32 = vmul.f32 %v2820_v54, %v2847_v13  ;;  %v1092_v33 = vmul.f32 %v2840_v7, %v2891_v51  ;;  %v2945_v60 = vld [vmem:[#allocation2 + $0x69] sm:$0xff]  ;;  %v2961_v9 = vld [vmem:[#allocation2 + $0x71] sm:$0xff] }
  0xfe   : > { %v1426_v15 = vadd.f32 %v1394_v6, %v1324_v4  ;;  %728 = vst.msk [vmem:[#allocation2 + $0xd0] sm:$0xff] %vm279_vm1, %v696_v14  ;;  %v592_v24 = vadd.f32 %v2488_v20, %v2799_v35  ;;  %v586_v25 = vpop.f32.mrb[13].mxu0  ;;  %v1224_v39 = vadd.f32 %v1192_v16, %v1123_v22  ;;  %v1395_v41 = vmul.f32 %v2873_v34, %v2918_v18  ;;  %v2959_v6 = vld [vmem:[#allocation2 + $0x70] sm:$0xff] }
  0xff   : > { %727 = vst.msk [vmem:[#allocation2 + $0xc8] sm:$0xff] %vm279_vm1, %v695_v19  ;;  %v587_v30 = vadd.f32 %v2799_v35, %v586_v25  ;;  %v1627_v38 = vadd.f32 %v1595_v11, %v1526_v21  ;;  %v1023_v46 = vadd.f32 %v991_v32, %v922_v23  ;;  %v1193_v61 = vmul.f32 %v2835_v5, %v2875_v36 }
 0x100   : > { %v1527_v29 = vadd.f32 %v1495_v52, %v1426_v15  ;;  %v698_v43 = vmax.f32 %v592_v24, 0.0  ;;  %v1325_v13 = vadd.f32 %v1293_v17, %v1224_v39  ;;  %v1496_v52 = vmul.f32 %v2861_v27, %v2927_v31 }
 0x101   : > { %v697_v47 = vmax.f32 %v587_v30, 0.0  ;;  %v2491_v48 = vpop.f32.mrb[14].mxu0  ;;  %v1666_v49 = vadd.f32 %v2925_v26, %v1627_v38  ;;  %v1294_v0 = vmul.f32 %v2845_v8, %v2877_v37  ;;  %v790_v1 = vmul.f32 %v2805_v40, %v2884_v45 }
 0x102   : > { %v1628_v44 = vadd.f32 %v1596_v59, %v1527_v29  ;;  %730 = vst.msk [vmem:[#allocation2 + $0xf0] sm:$0xff] %vm279_vm1, %v698_v43  ;;  %v602_v55 = vadd.f32 %v2491_v48, %v2799_v35  ;;  %v596_v56 = vpop.f32.mrb[15].mxu0  ;;  %v1124_v59 = vadd.f32 %v1092_v33, %v1023_v46  ;;  %v1427_v63 = vadd.f32 %v1395_v41, %v1325_v13 }
 0x103   : > { %729 = vst.msk [vmem:[#allocation2 + $0xe8] sm:$0xff] %vm279_vm1, %v697_v47  ;;  %v597_v62 = vadd.f32 %v2799_v35, %v596_v56  ;;  %2518 = vmatprep.mubr.msk.f32.mxu1 %vm279_vm1, %v1666_v49  ;;  %v1396_v4 = vmul.f32 %v2873_v34, %v2940_v53  ;;  %v891_v10 = vmul.f32 %v2810_v42, %v2889_v50 }
 0x104   : > { %v1667_v58 = vadd.f32 %v2925_v26, %v1628_v44  ;;  %v700_v2 = vmax.f32 %v602_v55, 0.0  ;;  %v1225_v3 = vadd.f32 %v1193_v61, %v1124_v59  ;;  %v1528_v14 = vadd.f32 %v1496_v52, %v1427_v63  ;;  %v3001_v61 = vld [vmem:[#allocation2 + $0x88] sm:$0xff] }
 0x105   : > { %v699_v11 = vmax.f32 %v597_v62, 0.0  ;;  %v2494_v12 = vpop.f32.mrb[16].mxu0  ;;  %v1597_v45 = vmul.f32 %v2866_v28, %v2945_v60  ;;  %v992_v15 = vmul.f32 %v2820_v54, %v2898_v57  ;;  %v923_v20 = vadd.f32 %v891_v10, %v790_v1 }
 0x106   : > { %2519 = vmatmul.mubr.msk.f32.vlgmr.msra.gmra.mrb[0].mxu1 %vm279_vm1, %v1667_v58  ;;  %732 = vst.msk [vmem:[#allocation2 + $0x110] sm:$0xff] %vm279_vm1, %v700_v2  ;;  %v612_v16 = vadd.f32 %v2494_v12, %v2799_v35  ;;  %v606_v17 = vpop.f32.mrb[17].mxu0  ;;  %v1326_v19 = vadd.f32 %v1294_v0, %v1225_v3  ;;  %v1093_v21 = vmul.f32 %v2840_v7, %v2918_v18  ;;  %v1562_v12 = vld [vmem:[#allocation2 + $0x89] sm:$0xff] }
 0x107   : > { %731 = vst.msk [vmem:[#allocation2 + $0x108] sm:$0xff] %vm279_vm1, %v699_v11  ;;  %v607_v50 = vadd.f32 %v2799_v35, %v606_v17  ;;  %v1629_v22 = vadd.f32 %v1597_v45, %v1528_v14  ;;  %v1497_v23 = vmul.f32 %v2861_v27, %v2959_v6  ;;  %v1598_v57 = vmul.f32 %v2866_v28, %v2961_v9  ;;  %v3013_v45 = vld [vmem:[#allocation2 + $0x8f] sm:$0xff] }
 0x108   : > { %v702_v24 = vmax.f32 %v612_v16, 0.0  ;;  %v1428_v25 = vadd.f32 %v1396_v4, %v1326_v19  ;;  %v1024_v29 = vadd.f32 %v992_v15, %v923_v20  ;;  %v1194_v32 = vmul.f32 %v2835_v5, %v2927_v31 }
 0x109   : > { %v701_v33 = vmax.f32 %v607_v50, 0.0  ;;  %v1668_v30 = vadd.f32 %v2925_v26, %v1629_v22  ;;  %v2497_v38 = vpop.f32.mrb[18].mxu0  ;;  %v791_v39 = vmul.f32 %v2805_v40, %v2891_v51  ;;  %v892_v41 = vmul.f32 %v2810_v42, %v2875_v36  ;;  %v2993_v51 = vld [vmem:[#allocation2 + $0x87] sm:$0xff] }
 0x10a   : > { %734 = vst.msk [vmem:[#allocation2 + $0x130] sm:$0xff] %vm279_vm1, %v702_v24  ;;  %v1529_v43 = vadd.f32 %v1497_v23, %v1428_v25  ;;  %v622_v44 = vadd.f32 %v2497_v38, %v2799_v35  ;;  %v616_v46 = vpop.f32.mrb[19].mxu0  ;;  %v1125_v47 = vadd.f32 %v1093_v21, %v1024_v29  ;;  %v1295_v48 = vmul.f32 %v2845_v8, %v2945_v60  ;;  %v3025_v23 = vld [vmem:[#allocation2 + $0x90] sm:$0xff] }
 0x10b   : > { %733 = vst.msk [vmem:[#allocation2 + $0x128] sm:$0xff] %vm279_vm1, %v701_v33  ;;  %2521 = vmatprep.mubr.msk.f32.mxu1 %vm279_vm1, %v1668_v30  ;;  %v617_v49 = vadd.f32 %v2799_v35, %v616_v46  ;;  %v924_v13 = vadd.f32 %v892_v41, %v791_v39  ;;  %v993_v36 = vmul.f32 %v2820_v54, %v2877_v37  ;;  %v3042_v46 = vld [vmem:[#allocation2 + $0xa7] sm:$0xff] }
 0x10c   : > { %v1094_v52 = vmul.f32 %v2840_v7, %v2940_v53  ;;  %v1630_v55 = vadd.f32 %v1598_v57, %v1529_v43  ;;  %v704_v56 = vmax.f32 %v622_v44, 0.0  ;;  %v1226_v58 = vadd.f32 %v1194_v32, %v1125_v47  ;;  %v3027_v57 = vld [vmem:[#allocation2 + $0x91] sm:$0xff] }
 0x10d   : > { %v1397_v59 = vmul.f32 %v2873_v34, %v2993_v51  ;;  %v703_v62 = vmax.f32 %v617_v49, 0.0  ;;  %v1498_v63 = vmul.f32 %v2861_v27, %v3001_v61  ;;  %v1025_v0 = vadd.f32 %v993_v36, %v924_v13  ;;  %v2500_v37 = vpop.f32.mrb[20].mxu0 }
 0x10e   : > { %v1195_v1 = vmul.f32 %v2835_v5, %v2959_v6  ;;  %v1669_v2 = vadd.f32 %v2925_v26, %v1630_v55  ;;  %736 = vst.msk [vmem:[#allocation2 + $0x150] sm:$0xff] %vm279_vm1, %v704_v56  ;;  %v1327_v3 = vadd.f32 %v1295_v48, %v1226_v58  ;;  %v1296_v4 = vmul.f32 %v2845_v8, %v2961_v9  ;;  %v626_v11 = vpop.f32.mrb[21].mxu0 }
 0x10f   : > { %v632_v10 = vadd.f32 %v2500_v37, %v2799_v35  ;;  %735 = vst.msk [vmem:[#allocation2 + $0x148] sm:$0xff] %vm279_vm1, %v703_v62  ;;  %v1126_v14 = vadd.f32 %v1094_v52, %v1025_v0  ;;  %v627_v15 = vadd.f32 %v2799_v35, %v626_v11  ;;  %v792_v16 = vmul.f32 %v2805_v40, %v2918_v18  ;;  %v3064_v37 = vld [vmem:[#allocation2 + $0xa9] sm:$0xff] }
 0x110   : > { %v893_v17 = vmul.f32 %v2810_v42, %v2927_v31  ;;  %2522 = vmatmul.mubr.msk.f32.gmra.mrb[2].mxu1 %vm279_vm1, %v1669_v2  ;;  %v1429_v19 = vadd.f32 %v1397_v59, %v1327_v3  ;;  %v1398_v20 = vmul.f32 %v2873_v34, %v3013_v45  ;;  %v994_v50 = vmul.f32 %v2820_v54, %v2945_v60 }
 0x111   : > { %v706_v21 = vmax.f32 %v632_v10, 0.0  ;;  %v1227_v22 = vadd.f32 %v1195_v1, %v1126_v14  ;;  %v705_v24 = vmax.f32 %v627_v15, 0.0  ;;  %v1095_v31 = vmul.f32 %v2840_v7, %v2993_v51  ;;  %v2503_v25 = vpop.f32.mrb[22].mxu0 }
 0x112   : > { %v925_v18 = vadd.f32 %v893_v17, %v792_v16  ;;  %v1530_v29 = vadd.f32 %v1498_v63, %v1429_v19  ;;  %v1599_v32 = vmul.f32 %v2866_v28, %v1562_v12  ;;  %v1499_v33 = vmul.f32 %v2861_v27, %v3025_v23  ;;  %v636_v60 = vpop.f32.mrb[23].mxu0 }
 0x113   : > { %738 = vst.msk [vmem:[#allocation2 + $0x170] sm:$0xff] %vm279_vm1, %v706_v21  ;;  %v1328_v30 = vadd.f32 %v1296_v4, %v1227_v22  ;;  %737 = vst.msk [vmem:[#allocation2 + $0x168] sm:$0xff] %vm279_vm1, %v705_v24  ;;  %v1196_v39 = vmul.f32 %v2835_v5, %v3001_v61  ;;  %v793_v41 = vmul.f32 %v2805_v40, %v2940_v53  ;;  %v3051_v53 = vld [vmem:[#allocation2 + $0xa8] sm:$0xff] }
 0x114   : > { %v1026_v38 = vadd.f32 %v994_v50, %v925_v18  ;;  %v1631_v43 = vadd.f32 %v1599_v32, %v1530_v29  ;;  %v1600_v44 = vmul.f32 %v2866_v28, %v3027_v57  ;;  %v894_v47 = vmul.f32 %v2810_v42, %v2959_v6  ;;  %v3090_v32 = vld [vmem:[#allocation2 + $0xb0] sm:$0xff] }
 0x115   : > { %v995_v48 = vmul.f32 %v2820_v54, %v2961_v9  ;;  %v1430_v49 = vadd.f32 %v1398_v20, %v1328_v30  ;;  %v1297_v36 = vmul.f32 %v2845_v8, %v1562_v12  ;;  %v1399_v52 = vmul.f32 %v2873_v34, %v3042_v46  ;;  %v3053_v55 = vpop.f32.mrb[24].mxu0 }
 0x116   : > { %v1127_v13 = vadd.f32 %v1095_v31, %v1026_v38  ;;  %v1670_v56 = vadd.f32 %v2925_v26, %v1631_v43  ;;  %v1500_v58 = vmul.f32 %v2861_v27, %v3051_v53  ;;  %v926_v6 = vadd.f32 %v894_v47, %v793_v41  ;;  %v646_v59 = vpop.f32.mrb[25].mxu0  ;;  %v3085_v31 = vld [vmem:[#allocation2 + $0xb1] sm:$0xff] }
 0x117   : > { %v1096_v9 = vmul.f32 %v2840_v7, %v3013_v45  ;;  %v1531_v62 = vadd.f32 %v1499_v33, %v1430_v49  ;;  %v1197_v0 = vmul.f32 %v2835_v5, %v3025_v23  ;;  %v642_v1 = vadd.f32 %v2503_v25, %v2799_v35 }
 0x118   : > { %v1228_v63 = vadd.f32 %v1196_v39, %v1127_v13  ;;  %2524 = vmatprep.mubr.msk.f32.mxu1 %vm279_vm1, %v1670_v56  ;;  %v1027_v2 = vadd.f32 %v995_v48, %v926_v6  ;;  %v637_v3 = vadd.f32 %v2799_v35, %v636_v60  ;;  %v794_v4 = vmul.f32 %v2805_v40, %v2993_v51  ;;  %v3114_v56 = vld [vmem:[#allocation2 + $0xc8] sm:$0xff] }
 0x119   : > { %v895_v10 = vmul.f32 %v2810_v42, %v3001_v61  ;;  %v1632_v11 = vadd.f32 %v1600_v44, %v1531_v62  ;;  %v708_v15 = vmax.f32 %v642_v1, 0.0  ;;  %v996_v16 = vmul.f32 %v2820_v54, %v1562_v12  ;;  %v3072_v17 = vpop.f32.mrb[26].mxu0  ;;  %v3083_v12 = vld [vmem:[#allocation2 + $0xaf] sm:$0xff] }
 0x11a   : > { %v1329_v14 = vadd.f32 %v1297_v36, %v1228_v63  ;;  %v1128_v19 = vadd.f32 %v1096_v9, %v1027_v2  ;;  %v707_v20 = vmax.f32 %v637_v3, 0.0  ;;  %v1097_v50 = vmul.f32 %v2840_v7, %v3042_v46  ;;  %v3076_v22 = vpop.f32.mrb[27].mxu0 }
 0x11b   : > { %v927_v21 = vadd.f32 %v895_v10, %v794_v4  ;;  %v1671_v51 = vadd.f32 %v2925_v26, %v1632_v11  ;;  %v1601_v61 = vmul.f32 %v2866_v28, %v3064_v37  ;;  %v1298_v18 = vmul.f32 %v2845_v8, %v3027_v57  ;;  %740 = vst.msk [vmem:[#allocation2 + $0x190] sm:$0xff] %vm279_vm1, %v708_v15 }
 0x11c   : > { %v1431_v24 = vadd.f32 %v1399_v52, %v1329_v14  ;;  %v1229_v25 = vadd.f32 %v1197_v0, %v1128_v19  ;;  %v1400_v29 = vmul.f32 %v2873_v34, %v3083_v12  ;;  %739 = vst.msk [vmem:[#allocation2 + $0x188] sm:$0xff] %vm279_vm1, %v707_v20  ;;  %v1198_v60 = vmul.f32 %v2835_v5, %v3051_v53 }
 0x11d   : > { %v1028_v33 = vadd.f32 %v996_v16, %v927_v21  ;;  %2525 = vmatmul.mubr.msk.f32.gmra.mrb[4].mxu1 %vm279_vm1, %v1671_v51  ;;  %v1501_v38 = vmul.f32 %v2861_v27, %v3090_v32  ;;  %v795_v39 = vmul.f32 %v2805_v40, %v3013_v45  ;;  %v896_v41 = vmul.f32 %v2810_v42, %v3025_v23  ;;  %v3102_v43 = vpop.f32.mrb[28].mxu0  ;;  %v3112_v45 = vld [vmem:[#allocation2 + $0xc7] sm:$0xff] }
 0x11e   : > { %v1532_v30 = vadd.f32 %v1500_v58, %v1431_v24  ;;  %v1330_v44 = vadd.f32 %v1298_v18, %v1229_v25  ;;  %v1602_v47 = vmul.f32 %v2866_v28, %v3085_v31  ;;  %v997_v49 = vmul.f32 %v2820_v54, %v3027_v57  ;;  %v3108_v13 = vpop.f32.mrb[29].mxu0  ;;  %v1566_v16 = vld [vmem:[#allocation2 + $0xc9] sm:$0xff] }
 0x11f   : > { %v1129_v48 = vadd.f32 %v1097_v50, %v1028_v33  ;;  %v1299_v52 = vmul.f32 %v2845_v8, %v3064_v37  ;;  %v928_v23 = vadd.f32 %v896_v41, %v795_v39  ;;  %v1098_v58 = vmul.f32 %v2840_v7, %v3083_v12  ;;  %v3141_v24 = vld [vmem:[#allocation2 + $0xcf] sm:$0xff] }
 0x120   : > { %v1633_v36 = vadd.f32 %v1601_v61, %v1532_v30  ;;  %v1432_v6 = vadd.f32 %v1400_v29, %v1330_v44  ;;  %v1401_v62 = vmul.f32 %v2873_v34, %v3112_v45  ;;  %v1502_v57 = vmul.f32 %v2861_v27, %v3114_v56  ;;  %v3145_v25 = vld [vmem:[#allocation2 + $0xd0] sm:$0xff] }
 0x121   : > { %v1230_v9 = vadd.f32 %v1198_v60, %v1129_v48  ;;  %v1029_v0 = vadd.f32 %v997_v49, %v928_v23  ;;  %v1199_v1 = vmul.f32 %v2835_v5, %v3090_v32  ;;  %v652_v2 = vadd.f32 %v3053_v55, %v2799_v35  ;;  %v3127_v3 = vpop.f32.mrb[30].mxu0  ;;  %v3147_v29 = vld [vmem:[#allocation2 + $0xd1] sm:$0xff] }
 0x122   : > { %v1672_v63 = vadd.f32 %v2925_v26, %v1633_v36  ;;  %v1533_v4 = vadd.f32 %v1501_v38, %v1432_v6  ;;  %v647_v11 = vadd.f32 %v2799_v35, %v646_v59  ;;  %v796_v14 = vmul.f32 %v2805_v40, %v3042_v46  ;;  %v3132_v15 = vpop.f32.mrb[31].mxu0  ;;  %v3164_v36 = vld [vmem:[#allocation2 + $0xe7] sm:$0xff] }
 0x123   : > { %v1331_v10 = vadd.f32 %v1299_v52, %v1230_v9  ;;  %v1130_v19 = vadd.f32 %v1098_v58, %v1029_v0  ;;  %v710_v20 = vmax.f32 %v652_v2, 0.0  ;;  %v897_v21 = vmul.f32 %v2810_v42, %v3051_v53 }
 0x124   : > { %2527 = vmatprep.mubr.msk.f32.mxu1 %vm279_vm1, %v1672_v63  ;;  %v998_v55 = vmul.f32 %v2820_v54, %v3064_v37  ;;  %v1634_v50 = vadd.f32 %v1602_v47, %v1533_v4  ;;  %v1300_v59 = vmul.f32 %v2845_v8, %v3085_v31  ;;  %v709_v46 = vmax.f32 %v647_v11, 0.0 }
 0x125   : > { %v1433_v51 = vadd.f32 %v1401_v62, %v1331_v10  ;;  %v1231_v61 = vadd.f32 %v1199_v1, %v1130_v19  ;;  %v1402_v18 = vmul.f32 %v2873_v34, %v3141_v24  ;;  %742 = vst.msk [vmem:[#allocation2 + $0x1b0] sm:$0xff] %vm279_vm1, %v710_v20  ;;  %v929_v53 = vadd.f32 %v897_v21, %v796_v14  ;;  %v3173_v62 = vld [vmem:[#allocation2 + $0xe8] sm:$0xff] }
 0x126   : > { %v1099_v37 = vmul.f32 %v2840_v7, %v3112_v45  ;;  %v1673_v33 = vadd.f32 %v2925_v26, %v1634_v50  ;;  %v1603_v30 = vmul.f32 %v2866_v28, %v1566_v16  ;;  %v1503_v38 = vmul.f32 %v2861_v27, %v3145_v25  ;;  %741 = vst.msk [vmem:[#allocation2 + $0x1a8] sm:$0xff] %vm279_vm1, %v709_v46  ;;  %v1568_v10 = vld [vmem:[#allocation2 + $0xe9] sm:$0xff] }
 0x127   : > { %v1534_v60 = vadd.f32 %v1502_v57, %v1433_v51  ;;  %v1332_v39 = vadd.f32 %v1300_v59, %v1231_v61  ;;  %v1030_v41 = vadd.f32 %v998_v55, %v929_v53  ;;  %v1200_v44 = vmul.f32 %v2835_v5, %v3114_v56 }
 0x128   : > { %v797_v47 = vmul.f32 %v2805_v40, %v3083_v12  ;;  %2528 = vmatmul.mubr.msk.f32.gmra.mrb[6].mxu1 %vm279_vm1, %v1673_v33  ;;  %v1604_v49 = vmul.f32 %v2866_v28, %v3147_v29  ;;  %v898_v52 = vmul.f32 %v2810_v42, %v3090_v32  ;;  %v999_v23 = vmul.f32 %v2820_v54, %v3085_v31 }
 0x129   : > { %v1635_v48 = vadd.f32 %v1603_v30, %v1534_v60  ;;  %v1434_v58 = vadd.f32 %v1402_v18, %v1332_v39  ;;  %v1131_v6 = vadd.f32 %v1099_v37, %v1030_v41  ;;  %v1301_v9 = vmul.f32 %v2845_v8, %v1566_v16  ;;  %v3198_v37 = vld [vmem:[#allocation2 + $0xf1] sm:$0xff] }
 0x12a   : > { %v1403_v12 = vmul.f32 %v2873_v34, %v3164_v36  ;;  %v1504_v63 = vmul.f32 %v2861_v27, %v3173_v62  ;;  %v930_v0 = vadd.f32 %v898_v52, %v797_v47  ;;  %v1100_v32 = vmul.f32 %v2840_v7, %v3141_v24  ;;  %v1468_v60 = vld [vmem:[#allocation2 + $0xf0] sm:$0xff] }
 0x12b   : > { %v1674_v57 = vadd.f32 %v2925_v26, %v1635_v48  ;;  %v1535_v1 = vadd.f32 %v1503_v38, %v1434_v58  ;;  %v1232_v31 = vadd.f32 %v1200_v44, %v1131_v6  ;;  %v1201_v2 = vmul.f32 %v2835_v5, %v3145_v25 }
 0x12c   : > { %v662_v4 = vadd.f32 %v3072_v17, %v2799_v35  ;;  %v1031_v11 = vadd.f32 %v999_v23, %v930_v0  ;;  %v657_v14 = vadd.f32 %v2799_v35, %v3076_v22  ;;  %v798_v19 = vmul.f32 %v2805_v40, %v3112_v45 }
 0x12d   : > { %2530 = vmatprep.mubr.msk.f32.mxu1 %vm279_vm1, %v1674_v57  ;;  %v899_v20 = vmul.f32 %v2810_v42, %v3114_v56  ;;  %v1636_v21 = vadd.f32 %v1604_v49, %v1535_v1  ;;  %v1333_v55 = vadd.f32 %v1301_v9, %v1232_v31  ;;  %v1000_v51 = vmul.f32 %v2820_v54, %v1566_v16  ;;  %v1367_v56 = vld [vmem:[#allocation2 + $0xef] sm:$0xff]  ;;  %v3216_v9 = vld [vmem:[#allocation2 + $0x107] sm:$0xff] }
 0x12e   : > { %v712_v50 = vmax.f32 %v662_v4, 0.0  ;;  %v1132_v59 = vadd.f32 %v1100_v32, %v1031_v11  ;;  %v711_v17 = vmax.f32 %v657_v14, 0.0  ;;  %v1101_v61 = vmul.f32 %v2840_v7, %v3164_v36 }
 0x12f   : > { %v931_v46 = vadd.f32 %v899_v20, %v798_v19  ;;  %v1675_v18 = vadd.f32 %v2925_v26, %v1636_v21  ;;  %v1435_v22 = vadd.f32 %v1403_v12, %v1333_v55  ;;  %v1605_v53 = vmul.f32 %v2866_v28, %v1568_v10  ;;  %v3218_v12 = vld [vmem:[#allocation2 + $0x108] sm:$0xff] }
 0x130   : > { %v1302_v45 = vmul.f32 %v2845_v8, %v3147_v29  ;;  %744 = vst.msk [vmem:[#allocation2 + $0x1d0] sm:$0xff] %vm279_vm1, %v712_v50  ;;  %v1233_v16 = vadd.f32 %v1201_v2, %v1132_v59  ;;  %v1404_v33 = vmul.f32 %v2873_v34, %v1367_v56  ;;  %743 = vst.msk [vmem:[#allocation2 + $0x1c8] sm:$0xff] %vm279_vm1, %v711_v17  ;;  %v1570_v20 = vld [vmem:[#allocation2 + $0x109] sm:$0xff] }
 0x131   : > { %v1032_v30 = vadd.f32 %v1000_v51, %v931_v46  ;;  %v1202_v38 = vmul.f32 %v2835_v5, %v3173_v62  ;;  %2531 = vmatmul.mubr.msk.f32.gmra.mrb[8].mxu1 %vm279_vm1, %v1675_v18  ;;  %v1536_v39 = vadd.f32 %v1504_v63, %v1435_v22  ;;  %v1505_v41 = vmul.f32 %v2861_v27, %v1468_v60  ;;  %v3239_v46 = vld [vmem:[#allocation2 + $0x10f] sm:$0xff] }
 0x132   : > { %v799_v44 = vmul.f32 %v2805_v40, %v3141_v24  ;;  %v900_v47 = vmul.f32 %v2810_v42, %v3145_v25  ;;  %v1334_v48 = vadd.f32 %v1302_v45, %v1233_v16  ;;  %v1606_v49 = vmul.f32 %v2866_v28, %v3198_v37  ;;  %v1571_v45 = vld [vmem:[#allocation2 + $0x111] sm:$0xff] }
 0x133   : > { %v1133_v52 = vadd.f32 %v1101_v61, %v1032_v30  ;;  %v1001_v23 = vmul.f32 %v2820_v54, %v3147_v29  ;;  %v1637_v58 = vadd.f32 %v1605_v53, %v1536_v39  ;;  %v1303_v6 = vmul.f32 %v2845_v8, %v1568_v10 }
 0x134   : > { %v932_v57 = vadd.f32 %v900_v47, %v799_v44  ;;  %v1102_v24 = vmul.f32 %v2840_v7, %v1367_v56  ;;  %v1436_v63 = vadd.f32 %v1404_v33, %v1334_v48  ;;  %v1405_v0 = vmul.f32 %v2873_v34, %v3216_v9  ;;  %v1470_v33 = vld [vmem:[#allocation2 + $0x110] sm:$0xff] }
 0x135   : > { %v1234_v25 = vadd.f32 %v1202_v38, %v1133_v52  ;;  %v1506_v32 = vmul.f32 %v2861_v27, %v3218_v12  ;;  %v1676_v29 = vadd.f32 %v2925_v26, %v1637_v58  ;;  %v1203_v31 = vmul.f32 %v2835_v5, %v1468_v60 }
 0x136   : > { %v1033_v1 = vadd.f32 %v1001_v23, %v932_v57  ;;  %v672_v2 = vadd.f32 %v3102_v43, %v2799_v35  ;;  %v1537_v4 = vadd.f32 %v1505_v41, %v1436_v63  ;;  %v667_v14 = vadd.f32 %v2799_v35, %v3108_v13 }
 0x137   : > { %v1335_v11 = vadd.f32 %v1303_v6, %v1234_v25  ;;  %v800_v19 = vmul.f32 %v2805_v40, %v3164_v36  ;;  %2533 = vmatprep.mubr.msk.f32.mxu1 %vm279_vm1, %v1676_v29  ;;  %v901_v50 = vmul.f32 %v2810_v42, %v3173_v62  ;;  %v1002_v51 = vmul.f32 %v2820_v54, %v1568_v10  ;;  %v1370_v6 = vld [vmem:[#allocation2 + $0x127] sm:$0xff] }
 0x138   : > { %v1134_v21 = vadd.f32 %v1102_v24, %v1033_v1  ;;  %v714_v55 = vmax.f32 %v672_v2, 0.0  ;;  %v1638_v59 = vadd.f32 %v1606_v49, %v1537_v4  ;;  %v1304_v17 = vmul.f32 %v2845_v8, %v3198_v37 }
 0x139   : > { %v1437_v43 = vadd.f32 %v1405_v0, %v1335_v11  ;;  %v713_v13 = vmax.f32 %v667_v14, 0.0  ;;  %v1406_v36 = vmul.f32 %v2873_v34, %v3239_v46  ;;  %v933_v18 = vadd.f32 %v901_v50, %v800_v19  ;;  %v1471_v19 = vld [vmem:[#allocation2 + $0x128] sm:$0xff] }
 0x13a   : > { %v1235_v61 = vadd.f32 %v1203_v31, %v1134_v21  ;;  %746 = vst.msk [vmem:[#allocation2 + $0x1f0] sm:$0xff] %vm279_vm1, %v714_v55  ;;  %v1103_v62 = vmul.f32 %v2840_v7, %v3216_v9  ;;  %v1677_v10 = vadd.f32 %v2925_v26, %v1638_v59  ;;  %v1607_v53 = vmul.f32 %v2866_v28, %v1570_v20  ;;  %v1572_v21 = vld [vmem:[#allocation2 + $0x129] sm:$0xff] }
 0x13b   : > { %v1538_v22 = vadd.f32 %v1506_v32, %v1437_v43  ;;  %745 = vst.msk [vmem:[#allocation2 + $0x1e8] sm:$0xff] %vm279_vm1, %v713_v13  ;;  %v1034_v30 = vadd.f32 %v1002_v51, %v933_v18  ;;  %v1204_v38 = vmul.f32 %v2835_v5, %v3218_v12  ;;  %v801_v39 = vmul.f32 %v2805_v40, %v1367_v56 }
 0x13c   : > { %v1336_v16 = vadd.f32 %v1304_v17, %v1235_v61  ;;  %2534 = vmatmul.mubr.msk.f32.gmra.mrb[10].mxu1 %vm279_vm1, %v1677_v10  ;;  %v1507_v44 = vmul.f32 %v2861_v27, %v1470_v33  ;;  %v902_v47 = vmul.f32 %v2810_v42, %v1468_v60  ;;  %v1003_v48 = vmul.f32 %v2820_v54, %v3198_v37  ;;  %v1573_v17 = vld [vmem:[#allocation2 + $0x131] sm:$0xff] }
 0x13d   : > { %v1639_v41 = vadd.f32 %v1607_v53, %v1538_v22  ;;  %v1608_v52 = vmul.f32 %v2866_v28, %v1571_v45  ;;  %v1135_v23 = vadd.f32 %v1103_v62, %v1034_v30  ;;  %v1305_v58 = vmul.f32 %v2845_v8, %v1570_v20  ;;  %v1472_v62 = vld [vmem:[#allocation2 + $0x130] sm:$0xff] }
 0x13e   : > { %v1438_v49 = vadd.f32 %v1406_v36, %v1336_v16  ;;  %v1407_v56 = vmul.f32 %v2873_v34, %v1370_v6  ;;  %v934_v24 = vadd.f32 %v902_v47, %v801_v39  ;;  %v1104_v63 = vmul.f32 %v2840_v7, %v3239_v46 }
 0x13f   : > { %v1678_v57 = vadd.f32 %v2925_v26, %v1639_v41  ;;  %v1236_v60 = vadd.f32 %v1204_v38, %v1135_v23  ;;  %v1205_v0 = vmul.f32 %v2835_v5, %v1470_v33  ;;  %v682_v37 = vadd.f32 %v3127_v3, %v2799_v35 }
 0x140   : > { %v1539_v25 = vadd.f32 %v1507_v44, %v1438_v49  ;;  %v1035_v32 = vadd.f32 %v1003_v48, %v934_v24  ;;  %v677_v29 = vadd.f32 %v2799_v35, %v3132_v15  ;;  %v802_v1 = vmul.f32 %v2805_v40, %v3216_v9  ;;  %v1372_v44 = vld [vmem:[#allocation2 + $0x147] sm:$0xff] }
 0x141   : > { %2536 = vmatprep.mubr.msk.f32.mxu1 %vm279_vm1, %v1678_v57  ;;  %v903_v31 = vmul.f32 %v2810_v42, %v3218_v12  ;;  %v1337_v4 = vadd.f32 %v1305_v58, %v1236_v60  ;;  %v716_v11 = vmax.f32 %v682_v37, 0.0  ;;  %v1004_v14 = vmul.f32 %v2820_v54, %v1570_v20  ;;  %v1371_v12 = vld [vmem:[#allocation2 + $0x12f] sm:$0xff] }
 0x142   : > { %v1640_v2 = vadd.f32 %v1608_v52, %v1539_v25  ;;  %v1136_v3 = vadd.f32 %v1104_v63, %v1035_v32  ;;  %v715_v55 = vmax.f32 %v677_v29, 0.0  ;;  %v1105_v51 = vmul.f32 %v2840_v7, %v1370_v6  ;;  %v1473_v63 = vld [vmem:[#allocation2 + $0x148] sm:$0xff]  ;;  %v3304_v25 = vld [vmem:[%s3722_s3 + $0x1] ss:$0 sm:$0xff] }
 0x143   : > { %v935_v50 = vadd.f32 %v903_v31, %v802_v1  ;;  %v1439_v15 = vadd.f32 %v1407_v56, %v1337_v4  ;;  %v1508_v9 = vmul.f32 %v2861_v27, %v1471_v19  ;;  %v1306_v59 = vmul.f32 %v2845_v8, %v1571_v45  ;;  %748 = vst.msk [vmem:[#allocation2 + $0x210] sm:$0xff] %vm279_vm1, %v716_v11  ;;  %v1575_v4 = vld [vmem:[#allocation2 + $0x151] sm:$0xff] }
 0x144   : > { %v1679_v35 = vadd.f32 %v2925_v26, %v1640_v2  ;;  %v1237_v43 = vadd.f32 %v1205_v0, %v1136_v3  ;;  %v1408_v20 = vmul.f32 %v2873_v34, %v1371_v12  ;;  %747 = vst.msk [vmem:[#allocation2 + $0x208] sm:$0xff] %vm279_vm1, %v715_v55  ;;  %v1206_v61 = vmul.f32 %v2835_v5, %v1471_v19  ;;  %v1373_v2 = vld [vmem:[#allocation2 + $0x14f] sm:$0xff] }
 0x145   : > { %v1036_v13 = vadd.f32 %v1004_v14, %v935_v50  ;;  %v1540_v36 = vadd.f32 %v1508_v9, %v1439_v15  ;;  %v1609_v18 = vmul.f32 %v2866_v28, %v1572_v21  ;;  %v803_v10 = vmul.f32 %v2805_v40, %v3239_v46 }
 0x146   : > { %2537 = vmatmul.mubr.msk.f32.gmra.mrb[12].mxu1 %vm279_vm1, %v1679_v35  ;;  %v904_v22 = vmul.f32 %v2810_v42, %v1470_v33  ;;  %v1338_v53 = vadd.f32 %v1306_v59, %v1237_v43  ;;  %v1509_v16 = vmul.f32 %v2861_v27, %v1472_v62  ;;  %v1005_v38 = vmul.f32 %v2820_v54, %v1571_v45  ;;  %v1574_v42 = vld [vmem:[#allocation2 + $0x149] sm:$0xff]  ;;  %v3298_v45 = vld [vmem:[%s3722_s3] ss:$0 sm:$0xff] }
 0x147   : > { %v1137_v30 = vadd.f32 %v1105_v51, %v1036_v13  ;;  %v1641_v39 = vadd.f32 %v1609_v18, %v1540_v36  ;;  %v1610_v41 = vmul.f32 %v2866_v28, %v1573_v17  ;;  %v1106_v48 = vmul.f32 %v2840_v7, %v1371_v12  ;;  %v1474_v51 = vld [vmem:[#allocation2 + $0x150] sm:$0xff] }
 0x148   : > { %v936_v47 = vadd.f32 %v904_v22, %v803_v10  ;;  %v1440_v49 = vadd.f32 %v1408_v20, %v1338_v53  ;;  %v1307_v23 = vmul.f32 %v2845_v8, %v1572_v21  ;;  %v1409_v40 = vmul.f32 %v2873_v34, %v1372_v44  ;;  %v1374_v20 = vld [vmem:[#allocation2 + $0x167] sm:$0xff]  ;;  %v3343_v53 = vld [vmem:[%s3722_s3 + $0x4] ss:$0 sm:$0xff] }
 0x149   : > { %v1238_v52 = vadd.f32 %v1206_v61, %v1137_v30  ;;  %v1680_v46 = vadd.f32 %v2925_v26, %v1641_v39  ;;  %v1207_v58 = vmul.f32 %v2835_v5, %v1472_v62  ;;  %v804_v57 = vmul.f32 %v3298_v45, %v1370_v6  ;;  %v3330_v61 = vld [vmem:[%s3722_s3 + $0x3] ss:$0 sm:$0xff]  ;;  %v1576_v22 = vld [vmem:[#allocation2 + $0x169] sm:$0xff] }
 0x14a   : > { %v1037_v33 = vadd.f32 %v1005_v38, %v936_v47  ;;  %v1541_v56 = vadd.f32 %v1509_v16, %v1440_v49  ;;  %v905_v60 = vmul.f32 %v3304_v25, %v1471_v19  ;;  %v1006_v0 = vmul.f32 %v2820_v54, %v1572_v21  ;;  %v1475_v39 = vld [vmem:[#allocation2 + $0x168] sm:$0xff] }
 0x14b   : > { %v1339_v24 = vadd.f32 %v1307_v23, %v1238_v52  ;;  %2539 = vmatprep.mubr.msk.f32.mxu1 %vm279_vm1, %v1680_v46  ;;  %v1510_v37 = vmul.f32 %v2861_v27, %v1473_v63  ;;  %v1611_v32 = vmul.f32 %v2866_v28, %v1574_v42  ;;  %v1308_v6 = vmul.f32 %v2845_v8, %v1573_v17 }
 0x14c   : > { %v1138_v29 = vadd.f32 %v1106_v48, %v1037_v33  ;;  %v1642_v1 = vadd.f32 %v1610_v41, %v1541_v56  ;;  %v937_v11 = vadd.f32 %v905_v60, %v804_v57  ;;  %v1107_v14 = vmul.f32 %v2840_v7, %v1372_v44  ;;  %v3323_v7 = vld [vmem:[%s3722_s3 + $0x2] ss:$0 sm:$0xff]  ;;  %v1375_v57 = vld [vmem:[#allocation2 + $0x16f] sm:$0xff] }
 0x14d   : > { %v1441_v31 = vadd.f32 %v1409_v40, %v1339_v24  ;;  %v1410_v19 = vmul.f32 %v2873_v34, %v1373_v2  ;;  %v1208_v54 = vmul.f32 %v2835_v5, %v1473_v63  ;;  %v805_v21 = vmul.f32 %v3298_v45, %v1371_v12 }
 0x14e   : > { %v1239_v3 = vadd.f32 %v1207_v58, %v1138_v29  ;;  %v1681_v55 = vadd.f32 %v2925_v26, %v1642_v1  ;;  %v1038_v35 = vadd.f32 %v1006_v0, %v937_v11  ;;  %v906_v8 = vmul.f32 %v3304_v25, %v1472_v62  ;;  %v3336_v62 = vld [vmem:[%s3722_s3 + $0x5] ss:$0 sm:$0xff]  ;;  %v3364_v11 = vld [vmem:[%s3722_s3 + $0x7] ss:$0 sm:$0xff] }
 0x14f   : > { %v1542_v50 = vadd.f32 %v1510_v37, %v1441_v31  ;;  %v1511_v9 = vmul.f32 %v2861_v27, %v1474_v51  ;;  %v1612_v59 = vmul.f32 %v2866_v28, %v1575_v4  ;;  %v1007_v5 = vmul.f32 %v3323_v7, %v1573_v17 }
 0x150   : > { %v1340_v15 = vadd.f32 %v1308_v6, %v1239_v3  ;;  %2540 = vmatmul.mubr.msk.f32.gmra.mrb[14].mxu1 %vm279_vm1, %v1681_v55  ;;  %v1139_v43 = vadd.f32 %v1107_v14, %v1038_v35  ;;  %v938_v13 = vadd.f32 %v906_v8, %v805_v21  ;;  %v1108_v36 = vmul.f32 %v3330_v61, %v1373_v2  ;;  %v3379_v35 = vld [vmem:[%s3722_s3 + $0x6] ss:$0 sm:$0xff] }
 0x151   : > { %v1643_v12 = vadd.f32 %v1611_v32, %v1542_v50  ;;  %v1309_v17 = vmul.f32 %v3336_v62, %v1574_v42  ;;  %v1411_v10 = vmul.f32 %v2873_v34, %v1374_v20  ;;  %v1209_v16 = vmul.f32 %v3343_v53, %v1474_v51 }
 0x152   : > { %v1442_v18 = vadd.f32 %v1410_v19, %v1340_v15  ;;  %v1240_v38 = vadd.f32 %v1208_v54, %v1139_v43  ;;  %v1039_v41 = vadd.f32 %v1007_v5, %v938_v13  ;;  %v806_v47 = vmul.f32 %v3298_v45, %v1372_v44  ;;  %v1577_v44 = vld [vmem:[#allocation2 + $0x171] sm:$0xff]  ;;  %v1376_v54 = vld [vmem:[#allocation2 + $0x187] sm:$0xff] }
 0x153   : > { %v1682_v30 = vadd.f32 %v2925_v26, %v1643_v12  ;;  %v1512_v49 = vmul.f32 %v2861_v27, %v1475_v39  ;;  %v907_v52 = vmul.f32 %v3304_v25, %v1473_v63  ;;  %v1008_v23 = vmul.f32 %v3323_v7, %v1574_v42  ;;  %v1578_v5 = vld [vmem:[#allocation2 + $0x189] sm:$0xff] }
 0x154   : > { %v1543_v48 = vadd.f32 %v1511_v9, %v1442_v18  ;;  %v1341_v40 = vadd.f32 %v1309_v17, %v1240_v38  ;;  %v1613_v46 = vmul.f32 %v2866_v28, %v1576_v22  ;;  %v1140_v33 = vadd.f32 %v1108_v36, %v1039_v41  ;;  %v1476_v28 = vld [vmem:[#allocation2 + $0x170] sm:$0xff] }
 0x155   : > { %2542 = vmatprep.mubr.msk.f32.mxu1 %vm279_vm1, %v1682_v30  ;;  %v1310_v58 = vmul.f32 %v3336_v62, %v1575_v4  ;;  %v1412_v24 = vmul.f32 %v2873_v34, %v1375_v57  ;;  %v939_v60 = vadd.f32 %v907_v52, %v806_v47  ;;  %v1109_v27 = vmul.f32 %v3330_v61, %v1374_v20  ;;  %v1377_v38 = vld [vmem:[#allocation2 + $0x18f] sm:$0xff] }
 0x156   : > { %v1644_v56 = vadd.f32 %v1612_v59, %v1543_v48  ;;  %v1443_v0 = vadd.f32 %v1411_v10, %v1341_v40  ;;  %v1241_v63 = vadd.f32 %v1209_v16, %v1140_v33  ;;  %v1210_v42 = vmul.f32 %v3343_v53, %v1475_v39  ;;  %v1477_v59 = vld [vmem:[#allocation2 + $0x188] sm:$0xff]  ;;  %v1579_v40 = vld [vmem:[#allocation2 + $0x191] sm:$0xff] }
 0x157   : > { %v807_v37 = vmul.f32 %v3298_v45, %v1373_v2  ;;  %v1040_v29 = vadd.f32 %v1008_v23, %v939_v60  ;;  %v908_v6 = vmul.f32 %v3304_v25, %v1474_v51  ;;  %v1009_v1 = vmul.f32 %v3323_v7, %v1575_v4  ;;  %v3370_v2 = vld [vmem:[%s3722_s3 + $0x8] ss:$0 sm:$0xff] }
 0x158   : > { %v1683_v32 = vadd.f32 %v2925_v26, %v1644_v56  ;;  %v1544_v31 = vadd.f32 %v1512_v49, %v1443_v0  ;;  %v1342_v34 = vadd.f32 %v1310_v58, %v1241_v63  ;;  %v1513_v14 = vmul.f32 %v3364_v11, %v1476_v28  ;;  %v1478_v58 = vld [vmem:[#allocation2 + $0x190] sm:$0xff] }
 0x159   : > { %v1614_v3 = vmul.f32 %v3370_v2, %v1577_v44  ;;  %v1141_v19 = vadd.f32 %v1109_v27, %v1040_v29  ;;  %v1311_v4 = vmul.f32 %v3336_v62, %v1576_v22  ;;  %v940_v21 = vadd.f32 %v908_v6, %v807_v37  ;;  %v1378_v29 = vld [vmem:[#allocation2 + $0x1a7] sm:$0xff] }
 0x15a   : > { %2543 = vmatmul.mubr.msk.f32.gmra.mrb[16].mxu1 %vm279_vm1, %v1683_v32  ;;  %v1110_v55 = vmul.f32 %v3330_v61, %v1375_v57  ;;  %v1645_v50 = vadd.f32 %v1613_v46, %v1544_v31  ;;  %v1444_v51 = vadd.f32 %v1412_v24, %v1342_v34  ;;  %v1413_v8 = vmul.f32 %v3379_v35, %v1376_v54  ;;  %v1580_v31 = vld [vmem:[#allocation2 + $0x1a9] sm:$0xff] }
 0x15b   : > { %v1211_v15 = vmul.f32 %v3343_v53, %v1476_v28  ;;  %v1242_v9 = vadd.f32 %v1210_v42, %v1141_v19  ;;  %v1041_v12 = vadd.f32 %v1009_v1, %v940_v21  ;;  %v808_v43 = vmul.f32 %v3298_v45, %v1374_v20 }
 0x15c   : > { %v909_v13 = vmul.f32 %v3304_v25, %v1475_v39  ;;  %v1684_v36 = vadd.f32 %v2925_v26, %v1645_v50  ;;  %v1545_v18 = vadd.f32 %v1513_v14, %v1444_v51  ;;  %v1514_v17 = vmul.f32 %v3364_v11, %v1477_v59  ;;  %v1479_v51 = vld [vmem:[#allocation2 + $0x1a8] sm:$0xff] }
 0x15d   : > { %v1010_v10 = vmul.f32 %v3323_v7, %v1576_v22  ;;  %v1343_v16 = vadd.f32 %v1311_v4, %v1242_v9  ;;  %v1142_v30 = vadd.f32 %v1110_v55, %v1041_v12  ;;  %v1111_v47 = vmul.f32 %v3330_v61, %v1376_v54  ;;  %v3410_v4 = vld [vmem:[%s3723_s4] ss:$0 sm:$0xff] }
 0x15e   : > { %v941_v41 = vadd.f32 %v909_v13, %v808_v43  ;;  %2545 = vmatprep.mubr.msk.f32.mxu1 %vm279_vm1, %v1684_v36  ;;  %v1646_v48 = vadd.f32 %v1614_v3, %v1545_v18  ;;  %v1615_v20 = vmul.f32 %v3370_v2, %v1578_v5  ;;  %v1312_v39 = vmul.f32 %v3336_v62, %v1577_v44  ;;  %v1379_v18 = vld [vmem:[#allocation2 + $0x1af] sm:$0xff] }
 0x15f   : > { %v1414_v49 = vmul.f32 %v3379_v35, %v1377_v38  ;;  %v1445_v52 = vadd.f32 %v1413_v8, %v1343_v16  ;;  %v1243_v23 = vadd.f32 %v1211_v15, %v1142_v30  ;;  %v1212_v22 = vmul.f32 %v3343_v53, %v1477_v59  ;;  %v1581_v16 = vld [vmem:[#allocation2 + $0x1b1] sm:$0xff] }
 0x160   : > { %v1042_v46 = vadd.f32 %v1010_v10, %v941_v41  ;;  %v1685_v33 = vadd.f32 %v2925_v26, %v1646_v48  ;;  %v809_v56 = vmul.f32 %v3298_v45, %v1375_v57  ;;  %v910_v24 = vmul.f32 %v3304_v25, %v1476_v28  ;;  %v1480_v48 = vld [vmem:[#allocation2 + $0x1b0] sm:$0xff] }
 0x161   : > { %v1011_v60 = vmul.f32 %v3323_v7, %v1577_v44  ;;  %v1546_v27 = vadd.f32 %v1514_v17, %v1445_v52  ;;  %v1344_v0 = vadd.f32 %v1312_v39, %v1243_v23  ;;  %v1515_v63 = vmul.f32 %v3364_v11, %v1478_v58 }
 0x162   : > { %v1143_v42 = vadd.f32 %v1111_v47, %v1042_v46  ;;  %2546 = vmatmul.mubr.msk.f32.gmra.mrb[18].mxu1 %vm279_vm1, %v1685_v33  ;;  %v1616_v37 = vmul.f32 %v3370_v2, %v1579_v40  ;;  %v1313_v32 = vmul.f32 %v3336_v62, %v1578_v5  ;;  %v942_v26 = vadd.f32 %v910_v24, %v809_v56  ;;  %v1380_v56 = vld [vmem:[#allocation2 + $0x1c7] sm:$0xff] }
 0x163   : > { %v1112_v6 = vmul.f32 %v3330_v61, %v1377_v38  ;;  %v1647_v57 = vadd.f32 %v1615_v20, %v1546_v27  ;;  %v1446_v1 = vadd.f32 %v1414_v49, %v1344_v0  ;;  %v1415_v44 = vmul.f32 %v3379_v35, %v1378_v29 }
 0x164   : > { %v1244_v28 = vadd.f32 %v1212_v22, %v1143_v42  ;;  %v1043_v34 = vadd.f32 %v1011_v60, %v942_v26  ;;  %v1213_v14 = vmul.f32 %v3343_v53, %v1478_v58  ;;  %v810_v3 = vmul.f32 %v3298_v45, %v1376_v54 }
 0x165   : > { %v911_v19 = vmul.f32 %v3304_v25, %v1477_v59  ;;  %v1686_v21 = vadd.f32 %v3410_v4, %v1647_v57  ;;  %v1547_v55 = vadd.f32 %v1515_v63, %v1446_v1  ;;  %v1012_v8 = vmul.f32 %v3323_v7, %v1578_v5  ;;  %v1582_v63 = vld [vmem:[#allocation2 + $0x1c9] sm:$0xff] }
 0x166   : > { %v1345_v50 = vadd.f32 %v1313_v32, %v1244_v28  ;;  %v1516_v15 = vmul.f32 %v3364_v11, %v1479_v51  ;;  %v1144_v9 = vadd.f32 %v1112_v6, %v1043_v34  ;;  %v1113_v54 = vmul.f32 %v3330_v61, %v1378_v29  ;;  %v1481_v57 = vld [vmem:[#allocation2 + $0x1c8] sm:$0xff] }
 0x167   : > { %v943_v12 = vadd.f32 %v911_v19, %v810_v3  ;;  %2548 = vmatprep.mubr.msk.f32.mxu1 %vm279_vm1, %v1686_v21  ;;  %v1648_v59 = vadd.f32 %v1616_v37, %v1547_v55  ;;  %v1617_v13 = vmul.f32 %v3370_v2, %v1580_v31  ;;  %v1314_v36 = vmul.f32 %v3336_v62, %v1579_v40  ;;  %v1381_v55 = vld [vmem:[#allocation2 + $0x1cf] sm:$0xff] }
 0x168   : > { %v1447_v43 = vadd.f32 %v1415_v44, %v1345_v50  ;;  %v1245_v17 = vadd.f32 %v1213_v14, %v1144_v9  ;;  %v1416_v10 = vmul.f32 %v3379_v35, %v1379_v18  ;;  %v1214_v30 = vmul.f32 %v3343_v53, %v1479_v51 }
 0x169   : > { %v1044_v5 = vadd.f32 %v1012_v8, %v943_v12  ;;  %v1687_v41 = vadd.f32 %v3410_v4, %v1648_v59  ;;  %v811_v20 = vmul.f32 %v3298_v45, %v1377_v38  ;;  %v912_v39 = vmul.f32 %v3304_v25, %v1478_v58 }
 0x16a   : > { %v1548_v47 = vadd.f32 %v1516_v15, %v1447_v43  ;;  %v1346_v49 = vadd.f32 %v1314_v36, %v1245_v17  ;;  %v1517_v52 = vmul.f32 %v3364_v11, %v1480_v48  ;;  %v1013_v46 = vmul.f32 %v3323_v7, %v1579_v40 }
 0x16b   : > { %v1145_v23 = vadd.f32 %v1113_v54, %v1044_v5  ;;  %2549 = vmatmul.mubr.msk.f32.gmra.mrb[20].mxu1 %vm279_vm1, %v1687_v41  ;;  %v1618_v33 = vmul.f32 %v3370_v2, %v1581_v16  ;;  %v944_v24 = vadd.f32 %v912_v39, %v811_v20  ;;  %v1114_v60 = vmul.f32 %v3330_v61, %v1379_v18  ;;  %v1482_v54 = vld [vmem:[#allocation2 + $0x1d0] sm:$0xff]  ;;  %v1382_v41 = vld [vmem:[#allocation2 + $0x1e7] sm:$0xff] }
 0x16c   : > { %v1649_v22 = vadd.f32 %v1617_v13, %v1548_v47  ;;  %v1448_v27 = vadd.f32 %v1416_v10, %v1346_v49  ;;  %v1315_v38 = vmul.f32 %v3336_v62, %v1580_v31  ;;  %v1417_v58 = vmul.f32 %v3379_v35, %v1380_v56  ;;  %v1583_v5 = vld [vmem:[#allocation2 + $0x1d1] sm:$0xff] }
 0x16d   : > { %v1246_v0 = vadd.f32 %v1214_v30, %v1145_v23  ;;  %v1045_v37 = vadd.f32 %v1013_v46, %v944_v24  ;;  %v1215_v40 = vmul.f32 %v3343_v53, %v1480_v48  ;;  %v812_v32 = vmul.f32 %v3298_v45, %v1378_v29  ;;  %v1483_v24 = vld [vmem:[#allocation2 + $0x1e8] sm:$0xff] }
 0x16e   : > { %v1688_v42 = vadd.f32 %v3410_v4, %v1649_v22  ;;  %v1549_v26 = vadd.f32 %v1517_v52, %v1448_v27  ;;  %v913_v1 = vmul.f32 %v3304_v25, %v1479_v51  ;;  %v1014_v28 = vmul.f32 %v3323_v7, %v1580_v31 }
 0x16f   : > { %v1347_v6 = vadd.f32 %v1315_v38, %v1246_v0  ;;  %v1518_v44 = vmul.f32 %v3364_v11, %v1481_v57  ;;  %v1619_v34 = vmul.f32 %v3370_v2, %v1582_v63  ;;  %v1146_v14 = vadd.f32 %v1114_v60, %v1045_v37  ;;  %v1383_v37 = vld [vmem:[#allocation2 + $0x1ef] sm:$0xff] }
 0x170   : > { %2551 = vmatprep.mubr.msk.f32.mxu1 %vm279_vm1, %v1688_v42  ;;  %v1316_v3 = vmul.f32 %v3336_v62, %v1581_v16  ;;  %v1650_v19 = vadd.f32 %v1618_v33, %v1549_v26  ;;  %v945_v29 = vadd.f32 %v913_v1, %v812_v32  ;;  %v1115_v50 = vmul.f32 %v3330_v61, %v1380_v56  ;;  %v1584_v32 = vld [vmem:[#allocation2 + $0x1e9] sm:$0xff] }
 0x171   : > { %v1449_v21 = vadd.f32 %v1417_v58, %v1347_v6  ;;  %v1247_v8 = vadd.f32 %v1215_v40, %v1146_v14  ;;  %v1418_v51 = vmul.f32 %v3379_v35, %v1381_v55  ;;  %v1216_v31 = vmul.f32 %v3343_v53, %v1481_v57 }
 0x172   : > { %v813_v15 = vmul.f32 %v3298_v45, %v1379_v18  ;;  %v1689_v9 = vadd.f32 %v3410_v4, %v1650_v19  ;;  %v1046_v59 = vadd.f32 %v1014_v28, %v945_v29  ;;  %v914_v43 = vmul.f32 %v3304_v25, %v1480_v48 }
 0x173   : > { %v1550_v12 = vadd.f32 %v1518_v44, %v1449_v21  ;;  %v1348_v13 = vadd.f32 %v1316_v3, %v1247_v8  ;;  %v1519_v36 = vmul.f32 %v3364_v11, %v1482_v54  ;;  %v1015_v17 = vmul.f32 %v3323_v7, %v1581_v16 }
 0x174   : > { %2552 = vmatmul.mubr.msk.f32.gmra.mrb[22].mxu1 %vm279_vm1, %v1689_v9  ;;  %v1147_v30 = vadd.f32 %v1115_v50, %v1046_v59  ;;  %v946_v47 = vadd.f32 %v914_v43, %v813_v15  ;;  %v1116_v18 = vmul.f32 %v3330_v61, %v1381_v55  ;;  %v1317_v39 = vmul.f32 %v3336_v62, %v1582_v63  ;;  %v1384_v15 = vld [vmem:[#allocation2 + $0x207] sm:$0xff] }
 0x175   : > { %v1651_v10 = vadd.f32 %v1619_v34, %v1550_v12  ;;  %v1450_v20 = vadd.f32 %v1418_v51, %v1348_v13  ;;  %v1419_v49 = vmul.f32 %v3379_v35, %v1382_v41  ;;  %v1217_v48 = vmul.f32 %v3343_v53, %v1482_v54  ;;  %v1484_v34 = vld [vmem:[#allocation2 + $0x1f0] sm:$0xff] }
 0x176   : > { %v1248_v23 = vadd.f32 %v1216_v31, %v1147_v30  ;;  %v1047_v16 = vadd.f32 %v1015_v17, %v946_v47  ;;  %v814_v46 = vmul.f32 %v3298_v45, %v1380_v56  ;;  %v1620_v33 = vmul.f32 %v3370_v2, %v1583_v5  ;;  %v1585_v51 = vld [vmem:[#allocation2 + $0x1f1] sm:$0xff]  ;;  %v1485_v17 = vld [vmem:[#allocation2 + $0x208] sm:$0xff] }
 0x177   : > { %v1690_v52 = vadd.f32 %v3410_v4, %v1651_v10  ;;  %v1551_v22 = vadd.f32 %v1519_v36, %v1450_v20  ;;  %v915_v60 = vmul.f32 %v3304_v25, %v1481_v57  ;;  %v1016_v27 = vmul.f32 %v3323_v7, %v1582_v63 }
 0x178   : > { %v1349_v0 = vadd.f32 %v1317_v39, %v1248_v23  ;;  %v1520_v38 = vmul.f32 %v3364_v11, %v1483_v24  ;;  %v1148_v58 = vadd.f32 %v1116_v18, %v1047_v16  ;;  %v1318_v42 = vmul.f32 %v3336_v62, %v1583_v5 }
 0x179   : > { %2554 = vmatprep.mubr.msk.f32.mxu1 %vm279_vm1, %v1690_v52  ;;  %v1652_v40 = vadd.f32 %v1620_v33, %v1551_v22  ;;  %v1420_v56 = vmul.f32 %v3379_v35, %v1383_v37  ;;  %v947_v26 = vadd.f32 %v915_v60, %v814_v46  ;;  %v1117_v6 = vmul.f32 %v3330_v61, %v1382_v41  ;;  %v1385_v52 = vld [vmem:[#allocation2 + $0x20f] sm:$0xff] }
 0x17a   : > { %v1451_v1 = vadd.f32 %v1419_v49, %v1349_v0  ;;  %v1249_v57 = vadd.f32 %v1217_v48, %v1148_v58  ;;  %v1218_v63 = vmul.f32 %v3343_v53, %v1483_v24  ;;  %v815_v28 = vmul.f32 %v3298_v45, %v1381_v55  ;;  %v1586_v22 = vld [vmem:[#allocation2 + $0x209] sm:$0xff] }
 0x17b   : > { %v1691_v44 = vadd.f32 %v3410_v4, %v1652_v40  ;;  %v1048_v14 = vadd.f32 %v1016_v27, %v947_v26  ;;  %v916_v3 = vmul.f32 %v3304_v25, %v1482_v54  ;;  %v1017_v19 = vmul.f32 %v3323_v7, %v1583_v5  ;;  %v1486_v0 = vld [vmem:[#allocation2 + $0x210] sm:$0xff]  ;;  %v1386_v40 = vld [vmem:[#allocation2 + $0x227] sm:$0xff] }
 0x17c   : > { %v1552_v21 = vadd.f32 %v1520_v38, %v1451_v1  ;;  %v1621_v29 = vmul.f32 %v3370_v2, %v1584_v32  ;;  %v1350_v50 = vadd.f32 %v1318_v42, %v1249_v57  ;;  %v1521_v8 = vmul.f32 %v3364_v11, %v1484_v34 }
 0x17d   : > { %2555 = vmatmul.mubr.msk.f32.gmra.mrb[24].mxu1 %vm279_vm1, %v1691_v44  ;;  %v1149_v31 = vadd.f32 %v1117_v6, %v1048_v14  ;;  %v1319_v55 = vmul.f32 %v3336_v62, %v1584_v32  ;;  %v948_v9 = vadd.f32 %v916_v3, %v815_v28  ;;  %v1118_v12 = vmul.f32 %v3330_v61, %v1383_v37  ;;  %v1487_v3 = vld [vmem:[#allocation2 + $0x228] sm:$0xff] }
 0x17e   : > { %v1653_v59 = vadd.f32 %v1621_v29, %v1552_v21  ;;  %v1452_v54 = vadd.f32 %v1420_v56, %v1350_v50  ;;  %v1421_v43 = vmul.f32 %v3379_v35, %v1384_v15  ;;  %v1219_v13 = vmul.f32 %v3343_v53, %v1484_v34  ;;  %v1588_v29 = vld [vmem:[#allocation2 + $0x229] sm:$0xff] }
 0x17f   : > { %v1250_v36 = vadd.f32 %v1218_v63, %v1149_v31  ;;  %v1049_v10 = vadd.f32 %v1017_v19, %v948_v9  ;;  %v816_v5 = vmul.f32 %v3298_v45, %v1382_v41  ;;  %v917_v30 = vmul.f32 %v3304_v25, %v1483_v24  ;;  %v1587_v63 = vld [vmem:[#allocation2 + $0x211] sm:$0xff] }
 0x180   : > { %v1692_v47 = vadd.f32 %v3410_v4, %v1653_v59  ;;  %v1553_v18 = vadd.f32 %v1521_v8, %v1452_v54  ;;  %v1622_v20 = vmul.f32 %v3370_v2, %v1585_v51  ;;  %v1018_v39 = vmul.f32 %v3323_v7, %v1584_v32  ;;  %v1387_v9 = vld [vmem:[#allocation2 + $0x22f] sm:$0xff] }
 0x181   : > { %v1351_v49 = vadd.f32 %v1319_v55, %v1250_v36  ;;  %v1150_v48 = vadd.f32 %v1118_v12, %v1049_v10  ;;  %v949_v23 = vadd.f32 %v917_v30, %v816_v5  ;;  %v1119_v16 = vmul.f32 %v3330_v61, %v1384_v15  ;;  %v1589_v5 = vld [vmem:[#allocation2 + $0x231] sm:$0xff] }
 0x182   : > { %2557 = vmatprep.mubr.msk.f32.mxu1 %vm279_vm1, %v1692_v47  ;;  %v1654_v46 = vadd.f32 %v1622_v20, %v1553_v18  ;;  %v1522_v41 = vmul.f32 %v3364_v11, %v1485_v17  ;;  %v1320_v33 = vmul.f32 %v3336_v62, %v1585_v51  ;;  %v1422_v24 = vmul.f32 %v3379_v35, %v1385_v52 }
 0x183   : > { %v1453_v60 = vadd.f32 %v1421_v43, %v1351_v49  ;;  %v1251_v27 = vadd.f32 %v1219_v13, %v1150_v48  ;;  %v1050_v38 = vadd.f32 %v1018_v39, %v949_v23  ;;  %v1220_v58 = vmul.f32 %v3343_v53, %v1485_v17  ;;  %v1488_v43 = vld [vmem:[#allocation2 + $0x230] sm:$0xff] }
 0x184   : > { %v1693_v42 = vadd.f32 %v3410_v4, %v1654_v46  ;;  %v817_v32 = vmul.f32 %v3298_v45, %v1383_v37  ;;  %v918_v56 = vmul.f32 %v3304_v25, %v1484_v34  ;;  %v1019_v26 = vmul.f32 %v3323_v7, %v1585_v51 }
 0x185   : > { %v1554_v6 = vadd.f32 %v1522_v41, %v1453_v60  ;;  %v1623_v1 = vmul.f32 %v3370_v2, %v1586_v22  ;;  %v1352_v57 = vadd.f32 %v1320_v33, %v1251_v27  ;;  %v1151_v28 = vadd.f32 %v1119_v16, %v1050_v38 }
 0x186   : > { %2558 = vmatmul.mubr.msk.f32.gmra.mrb[26].mxu1 %vm279_vm1, %v1693_v42  ;;  %v1523_v44 = vmul.f32 %v3364_v11, %v1486_v0  ;;  %v1321_v14 = vmul.f32 %v3336_v62, %v1586_v22  ;;  %v950_v19 = vadd.f32 %v918_v56, %v817_v32  ;;  %v1120_v45 = vmul.f32 %v3330_v61, %v1385_v52 }
 0x187   : > { %v1655_v37 = vadd.f32 %v1623_v1, %v1554_v6  ;;  %v1454_v25 = vadd.f32 %v1422_v24, %v1352_v57  ;;  %v1252_v34 = vadd.f32 %v1220_v58, %v1151_v28  ;;  %v1423_v7 = vmul.f32 %v3379_v35, %v1386_v40 }
 0x188   : > { %v1624_v21 = vmul.f32 %v3370_v2, %v1587_v63  ;;  %v1051_v50 = vadd.f32 %v1019_v26, %v950_v19  ;;  %v1221_v8 = vmul.f32 %v3343_v53, %v1486_v0  ;;  %v1524_v15 = vmul.f32 %v3364_v11, %v1487_v3 }
 0x189   : > { %v1694_v51 = vadd.f32 %v3410_v4, %v1655_v37  ;;  %v1555_v31 = vadd.f32 %v1523_v44, %v1454_v25  ;;  %v1353_v55 = vadd.f32 %v1321_v14, %v1252_v34  ;;  %v1625_v54 = vmul.f32 %v3370_v2, %v1588_v29 }
 0x18a   : > { %v1152_v12 = vadd.f32 %v1120_v45, %v1051_v50  ;;  %v1322_v36 = vmul.f32 %v3336_v62, %v1587_v63  ;;  %v1424_v53 = vmul.f32 %v3379_v35, %v1387_v9  ;;  %v1525_v47 = vmul.f32 %v3364_v11, %v1488_v43  ;;  %v3515_v11 = vld [vmem:[%s3725_s6] ss:$0 sm:$0xff] }
 0x18b   : > { %2560 = vmatprep.mubr.msk.f32.mxu1 %vm279_vm1, %v1694_v51  ;;  %v1656_v61 = vadd.f32 %v1624_v21, %v1555_v31  ;;  %v1455_v59 = vadd.f32 %v1423_v7, %v1353_v55  ;;  %v1626_v39 = vmul.f32 %v3370_v2, %v1589_v5 }
 0x18c   : > { %v1253_v13 = vadd.f32 %v1221_v8, %v1152_v12 }
 0x18d   : > { %v1695_v17 = vadd.f32 %v3410_v4, %v1656_v61  ;;  %v1556_v10 = vadd.f32 %v1524_v15, %v1455_v59 }
 0x18e   : > { %v1354_v30 = vadd.f32 %v1322_v36, %v1253_v13 }
 0x18f   : > { %2561 = vmatmul.mubr.msk.f32.gmra.mrb[28].mxu1 %vm279_vm1, %v1695_v17  ;;  %v1657_v18 = vadd.f32 %v1625_v54, %v1556_v10 }
 0x190   : > { %v1456_v20 = vadd.f32 %v1424_v53, %v1354_v30 }
 0x191   : > { %v1696_v49 = vadd.f32 %v3410_v4, %v1657_v18 }
 0x192   : > { %v1557_v48 = vadd.f32 %v1525_v47, %v1456_v20 }
 0x193   : > { %2563 = vmatprep.mubr.msk.f32.mxu1 %vm279_vm1, %v1696_v49 }
 0x194   : > { %v1658_v62 = vadd.f32 %v1626_v39, %v1557_v48 }
 0x196   : > { %v1697_v35 = vadd.f32 %v3410_v4, %v1658_v62 }
 0x198   : > { %2564 = vmatmul.mubr.msk.f32.gmra.mrb[30].mxu1 %vm279_vm1, %v1697_v35 }
 0x1d9   : > { %v2520_v52 = vpop.f32.mrb[0].mxu1 }
 0x1da   : > { %v1878_v23 = vadd.f32 %v2520_v52, %v3515_v11  ;;  %v1872_v16 = vpop.f32.mrb[1].mxu1 }
 0x1db   : > { %v1873_v46 = vadd.f32 %v3515_v11, %v1872_v16 }
 0x1dc   : > { %v2032_v2 = vmax.f32 %v1878_v23, 0.0 }
 0x1dd   : > { %v2031_v41 = vmax.f32 %v1873_v46, 0.0 }
 0x1de   : > { %2097 = vrot.lane.b32.xlu0 %v2032_v2, %s2627_s17 }
 0x1e2   : > { %2095 = vrot.lane.b32.xlu0 %v2031_v41, %s2627_s17 }
 0x1e3   : > { %v2523_v4 = vpop.f32.mrb[2].mxu1 }
 0x1e4   : > { %v1888_v22 = vadd.f32 %v2523_v4, %v3515_v11  ;;  %v1882_v33 = vpop.f32.mrb[3].mxu1 }
 0x1e5   : > { %v1883_v60 = vadd.f32 %v3515_v11, %v1882_v33 }
 0x1e6   : > { %v2034_v24 = vmax.f32 %v1888_v22, 0.0 }
 0x1e7   : > { %v2033_v27 = vmax.f32 %v1883_v60, 0.0  ;;  %v2586_v60 = vld [vmem:[%s2687_s8 + $0x8] sm:$0xff] }
 0x1e8   : > { %2101 = vrot.lane.b32.xlu1 %v2034_v24, %s2627_s17 }
 0x1ec   : > { %2099 = vrot.lane.b32.xlu1 %v2033_v27, %s2627_s17 }
 0x1f0   : > { %v2526_v0 = vpop.f32.mrb[4].mxu1 }
 0x1f1   : > { %v1898_v38 = vadd.f32 %v2526_v0, %v3515_v11  ;;  %v1892_v58 = vpop.f32.mrb[5].mxu1 }
 0x1f2   : > { %v1893_v42 = vadd.f32 %v3515_v11, %v1892_v58 }
 0x1f3   : > { %v2036_v40 = vmax.f32 %v1898_v38, 0.0 }
 0x1f4   : > { %v2035_v32 = vmax.f32 %v1893_v42, 0.0 }
 0x1f5   : > { %2105 = vrot.lane.b32.xlu1 %v2036_v40, %s2627_s17 }
 0x1f6   : > { %2103 = vrot.lane.b32.xlu0 %v2035_v32, %s2627_s17 }
 0x1fb   : > { %v2529_v56 = vpop.f32.mrb[6].mxu1 }
 0x1fc   : > { %v1908_v26 = vadd.f32 %v2529_v56, %v3515_v11  ;;  %v1902_v6 = vpop.f32.mrb[7].mxu1  ;;  %v2587_v56 = vld [vmem:[%s2687_s8] sm:$0xff] }
 0x1fd   : > { %v1903_v1 = vadd.f32 %v3515_v11, %v1902_v6 }
 0x1fe   : > { %v2038_v57 = vmax.f32 %v1908_v26, 0.0 }
 0x1ff   : > { %v2037_v63 = vmax.f32 %v1903_v1, 0.0 }
 0x200   : > { %2109 = vrot.lane.b32.xlu1 %v2038_v57, %s2627_s17 }
 0x201   : > { %2107 = vrot.lane.b32.xlu0 %v2037_v63, %s2627_s17 }
 0x204   : > { %v2532_v28 = vpop.f32.mrb[8].mxu1 }
 0x205   : > { %v1918_v44 = vadd.f32 %v2532_v28, %v3515_v11  ;;  %v1912_v14 = vpop.f32.mrb[9].mxu1 }
 0x206   : > { %v1913_v3 = vadd.f32 %v3515_v11, %v1912_v14  ;;  %v2588_v14 = vld [vmem:[%s2687_s8 + $0x18] sm:$0xff] }
 0x207   : > { %v2040_v19 = vmax.f32 %v1918_v44, 0.0 }
 0x208   : > { %v2039_v45 = vmax.f32 %v1913_v3, 0.0 }
 0x209   : > { %2113 = vrot.lane.b32.xlu1 %v2040_v19, %s2627_s17 }
 0x20a   : > { %2111 = vrot.lane.b32.xlu0 %v2039_v45, %s2627_s17 }
 0x20f   : > { %v2535_v37 = vpop.f32.mrb[10].mxu1 }
 0x210   : > { %v1928_v25 = vadd.f32 %v2535_v37, %v3515_v11  ;;  %v1922_v34 = vpop.f32.mrb[11].mxu1 }
 0x211   : > { %v1923_v7 = vadd.f32 %v3515_v11, %v1922_v34 }
 0x212   : > { %v2042_v21 = vmax.f32 %v1928_v25, 0.0  ;;  %v2589_v25 = vld [vmem:[%s2687_s8 + $0x10] sm:$0xff] }
 0x213   : > { %v2041_v29 = vmax.f32 %v1923_v7, 0.0 }
 0x214   : > { %2117 = vrot.lane.b32.xlu1 %v2042_v21, %s2627_s17 }
 0x215   : > { %2115 = vrot.lane.b32.xlu0 %v2041_v29, %s2627_s17 }
 0x219   : > { %v2538_v50 = vpop.f32.mrb[12].mxu1 }
 0x21a   : > { %v1938_v8 = vadd.f32 %v2538_v50, %v3515_v11  ;;  %v1932_v51 = vpop.f32.mrb[13].mxu1 }
 0x21b   : > { %v1933_v31 = vadd.f32 %v3515_v11, %v1932_v51 }
 0x21c   : > { %v2044_v55 = vmax.f32 %v1938_v8, 0.0 }
 0x21d   : > { %v2043_v15 = vmax.f32 %v1933_v31, 0.0 }
 0x21e   : > { %2121 = vrot.lane.b32.xlu1 %v2044_v55, %s2627_s17 }
 0x21f   : > { %2119 = vrot.lane.b32.xlu0 %v2043_v15, %s2627_s17  ;;  %v2590_v15 = vld [vmem:[%s2687_s8 + $0x28] sm:$0xff] }
 0x223   : > { %v2541_v9 = vpop.f32.mrb[14].mxu1 }
 0x224   : > { %v1948_v12 = vadd.f32 %v2541_v9, %v3515_v11  ;;  %v1942_v61 = vpop.f32.mrb[15].mxu1 }
 0x225   : > { %v1943_v59 = vadd.f32 %v3515_v11, %v1942_v61 }
 0x226   : > { %v2046_v54 = vmax.f32 %v1948_v12, 0.0  ;;  %v2591_v12 = vld [vmem:[%s2687_s8 + $0x20] sm:$0xff] }
 0x227   : > { %v2045_v43 = vmax.f32 %v1943_v59, 0.0 }
 0x228   : > { %2125 = vrot.lane.b32.xlu1 %v2046_v54, %s2627_s17 }
 0x229   : > { %2123 = vrot.lane.b32.xlu0 %v2045_v43, %s2627_s17 }
 0x22d   : > { %v2544_v13 = vpop.f32.mrb[16].mxu1 }
 0x22e   : > { %v1958_v36 = vadd.f32 %v2544_v13, %v3515_v11  ;;  %v1952_v53 = vpop.f32.mrb[17].mxu1 }
 0x22f   : > { %v1953_v17 = vadd.f32 %v3515_v11, %v1952_v53 }
 0x230   : > { %v2048_v10 = vmax.f32 %v1958_v36, 0.0 }
 0x231   : > { %v2047_v5 = vmax.f32 %v1953_v17, 0.0 }
 0x232   : > { %2129 = vrot.lane.b32.xlu1 %v2048_v10, %s2627_s17 }
 0x233   : > { %2127 = vrot.lane.b32.xlu0 %v2047_v5, %s2627_s17  ;;  %v2592_v5 = vld [vmem:[%s2687_s8 + $0x38] sm:$0xff] }
 0x235   : > { %v2547_v30 = vpop.f32.mrb[18].mxu1 }
 0x236   : > { %v1968_v47 = vadd.f32 %v2547_v30, %v3515_v11  ;;  %v1962_v18 = vpop.f32.mrb[19].mxu1 }
 0x237   : > { %v1963_v20 = vadd.f32 %v3515_v11, %v1962_v18 }
 0x238   : > { %v2050_v39 = vmax.f32 %v1968_v47, 0.0  ;;  %v2593_v47 = vld [vmem:[%s2687_s8 + $0x30] sm:$0xff] }
 0x239   : > { %v2049_v49 = vmax.f32 %v1963_v20, 0.0 }
 0x23a   : > { %2133 = vrot.lane.b32.xlu1 %v2050_v39, %s2627_s17  ;;  %v2594_v39 = vld [vmem:[%s2687_s8 + $0x48] sm:$0xff] }
 0x23b   : > { %2131 = vrot.lane.b32.xlu0 %v2049_v49, %s2627_s17 }
 0x23e   : > { %v2550_v48 = vpop.f32.mrb[20].mxu1 }
 0x23f   : > { %v1978_v62 = vadd.f32 %v2550_v48, %v3515_v11  ;;  %v1972_v35 = vpop.f32.mrb[21].mxu1  ;;  %v2595_v48 = vld [vmem:[%s2687_s8 + $0x40] sm:$0xff] }
 0x240   : > { %v1973_v52 = vadd.f32 %v3515_v11, %v1972_v35 }
 0x241   : > { %v2052_v23 = vmax.f32 %v1978_v62, 0.0 }
 0x242   : > { %v2051_v16 = vmax.f32 %v1973_v52, 0.0 }
 0x243   : > { %2137 = vrot.lane.b32.xlu1 %v2052_v23, %s2627_s17  ;;  %v2596_v23 = vld [vmem:[%s2687_s8 + $0x58] sm:$0xff] }
 0x244   : > { %2135 = vrot.lane.b32.xlu0 %v2051_v16, %s2627_s17 }
 0x247   : > { %v2553_v2 = vpop.f32.mrb[22].mxu1 }
 0x248   : > { %v1988_v46 = vadd.f32 %v2553_v2, %v3515_v11  ;;  %v1982_v41 = vpop.f32.mrb[23].mxu1  ;;  %v2597_v2 = vld [vmem:[%s2687_s8 + $0x50] sm:$0xff] }
 0x249   : > { %v1983_v4 = vadd.f32 %v3515_v11, %v1982_v41 }
 0x24a   : > { %v2054_v22 = vmax.f32 %v1988_v46, 0.0 }
 0x24b   : > { %v2053_v33 = vmax.f32 %v1983_v4, 0.0 }
 0x24c   : > { %2141 = vrot.lane.b32.xlu1 %v2054_v22, %s2627_s17  ;;  %v2598_v22 = vld [vmem:[%s2687_s8 + $0x68] sm:$0xff] }
 0x24d   : > { %2139 = vrot.lane.b32.xlu0 %v2053_v33, %s2627_s17 }
 0x250   : > { %v2098_v24 = vpop.permute.xlu0 %2097  ;;  %v2556_v0 = vpop.f32.mrb[24].mxu1 }
 0x251   : > { %v2192_v27 = vsel %vm279_vm1, %v2586_v60, %v2098_v24  ;;  %v1998_v38 = vadd.f32 %v2556_v0, %v3515_v11  ;;  %v1992_v58 = vpop.f32.mrb[25].mxu1  ;;  %v2599_v24 = vld [vmem:[%s2687_s8 + $0x60] sm:$0xff] }
 0x252   : > { %2224 = vst.msk [vmem:[%s3570_s20 + $0x8] sm:$0xff] %vm363_vm0, %v2192_v27  ;;  %v1993_v42 = vadd.f32 %v3515_v11, %v1992_v58 }
 0x253   : > { %v2056_v32 = vmax.f32 %v1998_v38, 0.0  ;;  %v2600_v38 = vld [vmem:[%s2687_s8 + $0x78] sm:$0xff] }
 0x254   : > { %v2096_v40 = vpop.permute.xlu0 %2095  ;;  %v2055_v6 = vmax.f32 %v1993_v42, 0.0  ;;  %v2601_v42 = vld [vmem:[%s2687_s8 + $0x70] sm:$0xff] }
 0x255   : > { %v2191_v26 = vsel %vm279_vm1, %v2587_v56, %v2096_v40  ;;  %2145 = vrot.lane.b32.xlu1 %v2056_v32, %s2627_s17 }
 0x256   : > { %2223 = vst.msk [vmem:[%s3570_s20] sm:$0xff] %vm363_vm0, %v2191_v26  ;;  %2143 = vrot.lane.b32.xlu0 %v2055_v6, %s2627_s17  ;;  %v2602_v26 = vld [vmem:[%s2687_s8 + $0x88] sm:$0xff] }
 0x259   : > { %v2559_v1 = vpop.f32.mrb[26].mxu1 }
 0x25a   : > { %v2008_v57 = vadd.f32 %v2559_v1, %v3515_v11  ;;  %v2002_v63 = vpop.f32.mrb[27].mxu1  ;;  %v2102_v28 = vpop.permute.xlu1 %2101  ;;  %v2603_v1 = vld [vmem:[%s2687_s8 + $0x80] sm:$0xff] }
 0x25b   : > { %v2003_v44 = vadd.f32 %v3515_v11, %v2002_v63  ;;  %v2194_v3 = vsel %vm279_vm1, %v2588_v14, %v2102_v28 }
 0x25c   : > { %v2058_v19 = vmax.f32 %v2008_v57, 0.0  ;;  %2226 = vst.msk [vmem:[%s3570_s20 + $0x18] sm:$0xff] %vm363_vm0, %v2194_v3  ;;  %v2605_v3 = vld [vmem:[%s2687_s8 + $0x90] sm:$0xff] }
 0x25d   : > { %v2057_v45 = vmax.f32 %v2003_v44, 0.0  ;;  %v2604_v44 = vld [vmem:[%s2687_s8 + $0x98] sm:$0xff] }
 0x25e   : > { %2149 = vrot.lane.b32.xlu1 %v2058_v19, %s2627_s17  ;;  %v2100_v37 = vpop.permute.xlu1 %2099 }
 0x25f   : > { %2147 = vrot.lane.b32.xlu0 %v2057_v45, %s2627_s17  ;;  %v2193_v34 = vsel %vm279_vm1, %v2589_v25, %v2100_v37  ;;  %v2606_v25 = vld [vmem:[%s2687_s8 + $0xa8] sm:$0xff] }
 0x260   : > { %2225 = vst.msk [vmem:[%s3570_s20 + $0x10] sm:$0xff] %vm363_vm0, %v2193_v34 }
 0x262   : > { %v2562_v7 = vpop.f32.mrb[28].mxu1 }
 0x263   : > { %v2018_v21 = vadd.f32 %v2562_v7, %v3515_v11  ;;  %v2012_v29 = vpop.f32.mrb[29].mxu1  ;;  %v2607_v7 = vld [vmem:[%s2687_s8 + $0xa0] sm:$0xff] }
 0x264   : > { %v2013_v50 = vadd.f32 %v3515_v11, %v2012_v29 }
 0x265   : > { %v2060_v8 = vmax.f32 %v2018_v21, 0.0 }
 0x266   : > { %v2059_v51 = vmax.f32 %v2013_v50, 0.0 }
 0x267   : > { %2153 = vrot.lane.b32.xlu1 %v2060_v8, %s2627_s17  ;;  %v2106_v31 = vpop.permute.xlu1 %2105  ;;  %v2608_v8 = vld [vmem:[%s2687_s8 + $0xb8] sm:$0xff] }
 0x268   : > { %2151 = vrot.lane.b32.xlu0 %v2059_v51, %s2627_s17  ;;  %v2104_v55 = vpop.permute.xlu0 %2103  ;;  %v2196_v9 = vsel %vm279_vm1, %v2590_v15, %v2106_v31  ;;  %v2609_v31 = vld [vmem:[%s2687_s8 + $0xb0] sm:$0xff] }
 0x269   : > { %v2195_v61 = vsel %vm279_vm1, %v2591_v12, %v2104_v55  ;;  %2228 = vst.msk [vmem:[%s3570_s20 + $0x28] sm:$0xff] %vm363_vm0, %v2196_v9  ;;  %v2610_v12 = vld [vmem:[%s2687_s8 + $0xc8] sm:$0xff] }
 0x26a   : > { %2227 = vst.msk [vmem:[%s3570_s20 + $0x20] sm:$0xff] %vm363_vm0, %v2195_v61 }
 0x26b   : > { %v2565_v59 = vpop.f32.mrb[30].mxu1 }
 0x26c   : > { %v2028_v54 = vadd.f32 %v2565_v59, %v3515_v11  ;;  %v2022_v43 = vpop.f32.mrb[31].mxu1  ;;  %v2611_v59 = vld [vmem:[%s2687_s8 + $0xc0] sm:$0xff] }
 0x26d   : > { %v2023_v13 = vadd.f32 %v3515_v11, %v2022_v43 }
 0x26e   : > { %v2062_v36 = vmax.f32 %v2028_v54, 0.0 }
 0x26f   : > { %v2061_v53 = vmax.f32 %v2023_v13, 0.0 }
 0x270   : > { %2157 = vrot.lane.b32.xlu1 %v2062_v36, %s2627_s17  ;;  %v2612_v36 = vld [vmem:[%s2687_s8 + $0xd8] sm:$0xff] }
 0x271   : > { %2155 = vrot.lane.b32.xlu0 %v2061_v53, %s2627_s17 }
 0x272   : > { %v2110_v17 = vpop.permute.xlu1 %2109 }
 0x273   : > { %v2108_v10 = vpop.permute.xlu0 %2107  ;;  %v2198_v30 = vsel %vm279_vm1, %v2592_v5, %v2110_v17  ;;  %v2613_v17 = vld [vmem:[%s2687_s8 + $0xd0] sm:$0xff] }
 0x274   : > { %v2197_v18 = vsel %vm279_vm1, %v2593_v47, %v2108_v10  ;;  %2230 = vst.msk [vmem:[%s3570_s20 + $0x38] sm:$0xff] %vm363_vm0, %v2198_v30  ;;  %v2614_v47 = vld [vmem:[%s2687_s8 + $0xe8] sm:$0xff] }
 0x275   : > { %2229 = vst.msk [vmem:[%s3570_s20 + $0x30] sm:$0xff] %vm363_vm0, %v2197_v18 }
 0x27b   : > { %v2114_v11 = vpop.permute.xlu1 %2113 }
 0x27c   : > { %v2112_v20 = vpop.permute.xlu0 %2111  ;;  %v2200_v49 = vsel %vm279_vm1, %v2594_v39, %v2114_v11  ;;  %v2615_v11 = vld [vmem:[%s2687_s8 + $0xe0] sm:$0xff] }
 0x27d   : > { %v2199_v62 = vsel %vm279_vm1, %v2595_v48, %v2112_v20  ;;  %2232 = vst.msk [vmem:[%s3570_s20 + $0x48] sm:$0xff] %vm363_vm0, %v2200_v49  ;;  %v2616_v48 = vld [vmem:[%s2687_s8 + $0xf8] sm:$0xff] }
 0x27e   : > { %2231 = vst.msk [vmem:[%s3570_s20 + $0x40] sm:$0xff] %vm363_vm0, %v2199_v62 }
 0x286   : > { %v2118_v35 = vpop.permute.xlu1 %2117 }
 0x287   : > { %v2116_v52 = vpop.permute.xlu0 %2115  ;;  %v2202_v16 = vsel %vm279_vm1, %v2596_v23, %v2118_v35  ;;  %v2617_v35 = vld [vmem:[%s2687_s8 + $0xf0] sm:$0xff] }
 0x288   : > { %v2201_v46 = vsel %vm279_vm1, %v2597_v2, %v2116_v52  ;;  %2234 = vst.msk [vmem:[%s3570_s20 + $0x58] sm:$0xff] %vm363_vm0, %v2202_v16 }
 0x289   : > { %2233 = vst.msk [vmem:[%s3570_s20 + $0x50] sm:$0xff] %vm363_vm0, %v2201_v46 }
 0x290   : > { %v2122_v41 = vpop.permute.xlu1 %2121 }
 0x291   : > { %v2120_v4 = vpop.permute.xlu0 %2119  ;;  %v2204_v33 = vsel %vm279_vm1, %v2598_v22, %v2122_v41 }
 0x292   : > { %v2203_v60 = vsel %vm279_vm1, %v2599_v24, %v2120_v4  ;;  %2236 = vst.msk [vmem:[%s3570_s20 + $0x68] sm:$0xff] %vm363_vm0, %v2204_v33 }
 0x293   : > { %2235 = vst.msk [vmem:[%s3570_s20 + $0x60] sm:$0xff] %vm363_vm0, %v2203_v60 }
 0x29a   : > { %v2126_v27 = vpop.permute.xlu1 %2125 }
 0x29b   : > { %v2124_v0 = vpop.permute.xlu0 %2123  ;;  %v2206_v58 = vsel %vm279_vm1, %v2600_v38, %v2126_v27 }
 0x29c   : > { %v2205_v40 = vsel %vm279_vm1, %v2601_v42, %v2124_v0  ;;  %2238 = vst.msk [vmem:[%s3570_s20 + $0x78] sm:$0xff] %vm363_vm0, %v2206_v58 }
 0x29d   : > { %2237 = vst.msk [vmem:[%s3570_s20 + $0x70] sm:$0xff] %vm363_vm0, %v2205_v40 }
 0x2a4   : > { %v2130_v32 = vpop.permute.xlu1 %2129 }
 0x2a5   : > { %v2128_v56 = vpop.permute.xlu0 %2127  ;;  %v2208_v6 = vsel %vm279_vm1, %v2602_v26, %v2130_v32 }
 0x2a6   : > { %v2207_v57 = vsel %vm279_vm1, %v2603_v1, %v2128_v56  ;;  %2240 = vst.msk [vmem:[%s3570_s20 + $0x88] sm:$0xff] %vm363_vm0, %v2208_v6 }
 0x2a7   : > { %2239 = vst.msk [vmem:[%s3570_s20 + $0x80] sm:$0xff] %vm363_vm0, %v2207_v57 }
 0x2ac   : > { %v2134_v63 = vpop.permute.xlu1 %2133 }
 0x2ad   : > { %v2132_v28 = vpop.permute.xlu0 %2131  ;;  %v2210_v14 = vsel %vm279_vm1, %v2604_v44, %v2134_v63 }
 0x2ae   : > { %v2209_v19 = vsel %vm279_vm1, %v2605_v3, %v2132_v28  ;;  %2242 = vst.msk [vmem:[%s3570_s20 + $0x98] sm:$0xff] %vm363_vm0, %v2210_v14 }
 0x2af   : > { %2241 = vst.msk [vmem:[%s3570_s20 + $0x90] sm:$0xff] %vm363_vm0, %v2209_v19 }
 0x2b5   : > { %v2138_v45 = vpop.permute.xlu1 %2137 }
 0x2b6   : > { %v2136_v37 = vpop.permute.xlu0 %2135  ;;  %v2212_v34 = vsel %vm279_vm1, %v2606_v25, %v2138_v45 }
 0x2b7   : > { %v2211_v21 = vsel %vm279_vm1, %v2607_v7, %v2136_v37  ;;  %2244 = vst.msk [vmem:[%s3570_s20 + $0xa8] sm:$0xff] %vm363_vm0, %v2212_v34 }
 0x2b8   : > { %2243 = vst.msk [vmem:[%s3570_s20 + $0xa0] sm:$0xff] %vm363_vm0, %v2211_v21 }
 0x2be   : > { %v2142_v29 = vpop.permute.xlu1 %2141 }
 0x2bf   : > { %v2140_v50 = vpop.permute.xlu0 %2139  ;;  %v2214_v51 = vsel %vm279_vm1, %v2608_v8, %v2142_v29 }
 0x2c0   : > { %v2213_v55 = vsel %vm279_vm1, %v2609_v31, %v2140_v50  ;;  %2246 = vst.msk [vmem:[%s3570_s20 + $0xb8] sm:$0xff] %vm363_vm0, %v2214_v51 }
 0x2c1   : > { %2245 = vst.msk [vmem:[%s3570_s20 + $0xb0] sm:$0xff] %vm363_vm0, %v2213_v55 }
 0x2c7   : > { %v2146_v15 = vpop.permute.xlu1 %2145 }
 0x2c8   : > { %v2144_v9 = vpop.permute.xlu0 %2143  ;;  %v2216_v61 = vsel %vm279_vm1, %v2610_v12, %v2146_v15 }
 0x2c9   : > { %v2215_v54 = vsel %vm279_vm1, %v2611_v59, %v2144_v9  ;;  %2248 = vst.msk [vmem:[%s3570_s20 + $0xc8] sm:$0xff] %vm363_vm0, %v2216_v61 }
 0x2ca   : > { %2247 = vst.msk [vmem:[%s3570_s20 + $0xc0] sm:$0xff] %vm363_vm0, %v2215_v54 }
 0x2d0   : > { %v2150_v43 = vpop.permute.xlu1 %2149 }
 0x2d1   : > { %v2148_v13 = vpop.permute.xlu0 %2147  ;;  %v2218_v53 = vsel %vm279_vm1, %v2612_v36, %v2150_v43 }
 0x2d2   : > { %v2217_v10 = vsel %vm279_vm1, %v2613_v17, %v2148_v13  ;;  %2250 = vst.msk [vmem:[%s3570_s20 + $0xd8] sm:$0xff] %vm363_vm0, %v2218_v53 }
 0x2d3   : > { %2249 = vst.msk [vmem:[%s3570_s20 + $0xd0] sm:$0xff] %vm363_vm0, %v2217_v10 }
 0x2d9   : > { %v2154_v5 = vpop.permute.xlu1 %2153 }
 0x2da   : > { %v2152_v30 = vpop.permute.xlu0 %2151  ;;  %v2220_v18 = vsel %vm279_vm1, %v2614_v47, %v2154_v5 }
 0x2db   : > { %v2219_v20 = vsel %vm279_vm1, %v2615_v11, %v2152_v30  ;;  %2252 = vst.msk [vmem:[%s3570_s20 + $0xe8] sm:$0xff] %vm363_vm0, %v2220_v18 }
 0x2dc   : > { %2251 = vst.msk [vmem:[%s3570_s20 + $0xe0] sm:$0xff] %vm363_vm0, %v2219_v20 }
 0x2e2   : > { %v2158_v39 = vpop.permute.xlu1 %2157 }
 0x2e3   : > { %v2156_v49 = vpop.permute.xlu0 %2155  ;;  %v2222_v62 = vsel %vm279_vm1, %v2616_v48, %v2158_v39 }
 0x2e4   : > { %v2221_v52 = vsel %vm279_vm1, %v2617_v35, %v2156_v49  ;;  %2254 = vst.msk [vmem:[%s3570_s20 + $0xf8] sm:$0xff] %vm363_vm0, %v2222_v62 }
 0x2e5   : > { %2253 = vst.msk [vmem:[%s3570_s20 + $0xf0] sm:$0xff] %vm363_vm0, %v2221_v52 }
 0x2e6 PF: > { %s17_s24 = sadd.s32 1, %s2624_s24  }
 0x2e7   : > { %p14_p4 = scmp.ge.s32.totalorder %s17_s24, 4  }
 0x2e9   :  { %16 = sbr.rel (!%p14_p4) target bundleno = 1 (0x1), region = 81 }

</bundles_post_ra>
